<compile_context>
chip_gen: v5e
topology: v5e:2x2
jax: 0.10.0
libtpu: 0.0.40
codegen_flags: <defaults>
</compile_context>

<pallas_src>
import jax
import jax.numpy as jnp
import numpy as np
from jax.experimental import pallas as pl
from jax.experimental.pallas import tpu as pltpu

IMG_DIM = 512
CLIN_DIM = 32
FUSED_DIM = 256
NUM_CLASSES = 2
HEAD_PAD = 128          # lane-dense padded width of the fused (classifier+risk) head

# Row offsets inside the packed weight slab (all multiples of 16 -> bf16 tile aligned)
R_WIMG = 0
R_WCLIN = R_WIMG + IMG_DIM          # 512
R_W1I = R_WCLIN + CLIN_DIM          # 544
R_W1C = R_W1I + FUSED_DIM           # 800
R_W2 = R_W1C + FUSED_DIM            # 1056
R_WHEAD = R_W2 + FUSED_DIM          # 1312
W_ROWS = R_WHEAD + FUSED_DIM        # 1568

B_ROWS = 8                          # bias slab rows (padded to sublane multiple)


def _round_up(x, m):
    return ((x + m - 1) // m) * m


def fusion_kernel(fimg_ref, fclin_ref, w_ref, b_ref, head_ref, fused_ref):
    # Activations are f32 in VMEM; cast to bf16 only at the dot operands.
    x_img = fimg_ref[...].astype(jnp.bfloat16)    # (TB, 512)
    x_clin = fclin_ref[...].astype(jnp.bfloat16)  # (TB, 32)

    # Static slices of the resident bf16 weight slab, fed directly to the MXU.
    w_img = w_ref[R_WIMG:R_WCLIN, :]
    w_clin = w_ref[R_WCLIN:R_W1I, :]
    w1i = w_ref[R_W1I:R_W1C, :]
    w1c = w_ref[R_W1C:R_W2, :]
    w2 = w_ref[R_W2:R_WHEAD, :]
    w_head = w_ref[R_WHEAD:W_ROWS, 0:HEAD_PAD]

    # Projections (bf16 x bf16 -> f32 accumulation)
    img_feat = (
        jnp.dot(x_img, w_img, preferred_element_type=jnp.float32) + b_ref[0:1, :]
    )
    clin_feat = (
        jnp.dot(x_clin, w_clin, preferred_element_type=jnp.float32) + b_ref[1:2, :]
    )

    # Gate MLP: Linear(2*fused -> fused) + ReLU + Linear(fused -> fused) + Sigmoid
    # (concat folded into split weights: img half / clin half)
    h = (
        jnp.dot(img_feat.astype(jnp.bfloat16), w1i, preferred_element_type=jnp.float32)
        + jnp.dot(clin_feat.astype(jnp.bfloat16), w1c, preferred_element_type=jnp.float32)
        + b_ref[2:3, :]
    )
    h = jnp.maximum(h, 0.0)
    gate = jax.nn.sigmoid(
        jnp.dot(h.astype(jnp.bfloat16), w2, preferred_element_type=jnp.float32)
        + b_ref[3:4, :]
    )

    # Fusion: gate*img + (1-gate)*clin  ==  clin + gate*(img - clin)
    fused = clin_feat + gate * (img_feat - clin_feat)

    # Fused heads: classifier (cols 0:2) + risk (col 2), lane-dense 128-wide output
    head_ref[...] = (
        jnp.dot(fused.astype(jnp.bfloat16), w_head, preferred_element_type=jnp.float32)
        + b_ref[4:5, 0:HEAD_PAD]
    )
    fused_ref[...] = fused


def fusion_forward(f_img, f_clin, w_pack, b_pack, *, tile_b=512):
    B = f_img.shape[0]
    # Shrink the tile for small batches; keep rows a multiple of 8 (sublane).
    # TODO(synk): on v7x, pick tile_b so cdiv(B, tb) >= 2 (and even) to feed both TCs.
    tb = _round_up(min(tile_b, _round_up(B, 8)), 8)
    nb = pl.cdiv(B, tb)   # partial last block handled by Pallas (no jnp.pad copy)

    grid_spec = pltpu.PrefetchScalarGridSpec(
        num_scalar_prefetch=0,
        grid=(nb,),
        in_specs=[
            pl.BlockSpec((tb, IMG_DIM), lambda i: (i, 0)),
            pl.BlockSpec((tb, CLIN_DIM), lambda i: (i, 0)),
            # weight / bias slabs: same block for every grid step -> VMEM-resident
            pl.BlockSpec((W_ROWS, FUSED_DIM), lambda i: (0, 0)),
            pl.BlockSpec((B_ROWS, FUSED_DIM), lambda i: (0, 0)),
        ],
        out_specs=(
            pl.BlockSpec((tb, HEAD_PAD), lambda i: (i, 0)),
            pl.BlockSpec((tb, FUSED_DIM), lambda i: (i, 0)),
        ),
    )

    head, fused = pl.pallas_call(
        fusion_kernel,
        out_shape=(
            jax.ShapeDtypeStruct((B, HEAD_PAD), jnp.float32),
            jax.ShapeDtypeStruct((B, FUSED_DIM), jnp.float32),
        ),
        grid_spec=grid_spec,
        compiler_params=pltpu.CompilerParams(
            dimension_semantics=("parallel",),       # batch axis -> both TCs on v7x
            vmem_limit_bytes=32 * 1024 * 1024,       # safe on v5e/v6e/v7x
        ),
    )(f_img, f_clin, w_pack, b_pack)

    logits = head[:, :NUM_CLASSES]
    risk = head[:, NUM_CLASSES:NUM_CLASSES + 1]
    return logits, risk, fused


def init_params(key):
    """Deterministic synthetic nn.Linear-style parameters, laid out as (in, out)."""
    ks = jax.random.split(key, 6)

    def lin(k, fan_in, fan_out):
        kw, kb = jax.random.split(k)
        scale = 1.0 / np.sqrt(fan_in)
        w = jax.random.uniform(kw, (fan_in, fan_out), jnp.float32, -scale, scale)
        b = jax.random.uniform(kb, (1, fan_out), jnp.float32, -scale, scale)
        return w, b

    w_img, b_img = lin(ks[0], IMG_DIM, FUSED_DIM)
    w_clin, b_clin = lin(ks[1], CLIN_DIM, FUSED_DIM)
    w1, b1 = lin(ks[2], 2 * FUSED_DIM, FUSED_DIM)
    w1_img, w1_clin = w1[:FUSED_DIM], w1[FUSED_DIM:]
    w2, b2 = lin(ks[3], FUSED_DIM, FUSED_DIM)
    w_cls, b_cls = lin(ks[4], FUSED_DIM, NUM_CLASSES)
    w_risk, b_risk = lin(ks[5], FUSED_DIM, 1)

    return (w_img, b_img, w_clin, b_clin, w1_img, w1_clin, b1,
            w2, b2, w_cls, b_cls, w_risk, b_risk)


def pack_params(params):
    """Pack 13 parameters into one bf16 weight slab + one f32 bias slab."""
    (w_img, b_img, w_clin, b_clin, w1i, w1c, b1,
     w2, b2, w_cls, b_cls, w_risk, b_risk) = params

    # fused head weight, zero-padded to 256 cols (kernel reads cols 0:128)
    w_head = jnp.zeros((FUSED_DIM, FUSED_DIM), jnp.float32)
    w_head = w_head.at[:, :NUM_CLASSES].set(w_cls)
    w_head = w_head.at[:, NUM_CLASSES:NUM_CLASSES + 1].set(w_risk)

    w_pack = jnp.concatenate(
        [w_img, w_clin, w1i, w1c, w2, w_head], axis=0
    ).astype(jnp.bfloat16)                                    # (1568, 256) bf16

    b_head = jnp.zeros((1, FUSED_DIM), jnp.float32)
    b_head = b_head.at[:, :NUM_CLASSES].set(b_cls)
    b_head = b_head.at[:, NUM_CLASSES:NUM_CLASSES + 1].set(b_risk)

    b_pack = jnp.concatenate(
        [b_img, b_clin, b1, b2, b_head, jnp.zeros((3, FUSED_DIM), jnp.float32)],
        axis=0,
    )                                                         # (8, 256) f32
    return w_pack, b_pack


def fusion_reference(f_img, f_clin, w_pack, b_pack):
    """Pure-JAX reference mirroring the kernel's bf16 matmul operands."""
    def mm(x, w):  # bf16 x bf16 -> f32 accumulation, like the kernel
        return jnp.dot(x.astype(jnp.bfloat16), w, preferred_element_type=jnp.float32)

    w_img = w_pack[R_WIMG:R_WCLIN]
    w_clin = w_pack[R_WCLIN:R_W1I]
    w1 = jnp.concatenate([w_pack[R_W1I:R_W1C], w_pack[R_W1C:R_W2]], axis=0)
    w2 = w_pack[R_W2:R_WHEAD]
    w_head = w_pack[R_WHEAD:W_ROWS, :HEAD_PAD]
    b_img, b_clin, b1, b2 = b_pack[0:1], b_pack[1:2], b_pack[2:3], b_pack[3:4]
    b_head = b_pack[4:5, :HEAD_PAD]

    img_feat = mm(f_img, w_img) + b_img
    clin_feat = mm(f_clin, w_clin) + b_clin
    combined = jnp.concatenate([img_feat, clin_feat], axis=1)
    gate = jax.nn.sigmoid(mm(jnp.maximum(mm(combined, w1) + b1, 0.0), w2) + b2)
    fused = gate * img_feat + (1.0 - gate) * clin_feat
    head = mm(fused, w_head) + b_head
    return head[:, :NUM_CLASSES], head[:, NUM_CLASSES:NUM_CLASSES + 1], fused


if __name__ == "__main__":
    key = jax.random.PRNGKey(0)
    k_params, k_img, k_clin = jax.random.split(key, 3)

    B = 24  # small batch; tile_b=16 -> 2 grid steps incl. one partial block
    f_img = jax.random.normal(k_img, (B, IMG_DIM), jnp.float32)
    f_clin = jax.random.normal(k_clin, (B, CLIN_DIM), jnp.float32)

    params = init_params(k_params)
    w_pack, b_pack = pack_params(params)

    logits, risk, fused = fusion_forward(f_img, f_clin, w_pack, b_pack, tile_b=16)
    jax.block_until_ready((logits, risk, fused))

    # sanity-check against pure-JAX reference (same bf16-quantized operands)
    ref_logits, ref_risk, ref_fused = fusion_reference(f_img, f_clin, w_pack, b_pack)
    np.testing.assert_allclose(np.asarray(logits), np.asarray(ref_logits),
                               rtol=2e-3, atol=2e-3)
    np.testing.assert_allclose(np.asarray(risk), np.asarray(ref_risk),
                               rtol=2e-3, atol=2e-3)
    np.testing.assert_allclose(np.asarray(fused), np.asarray(ref_fused),
                               rtol=2e-3, atol=2e-3)

    print("KERNEL_OK")
</pallas_src>

<mosaic_0001>
module attributes {stable_mosaic.version = 11 : i64} {
  func.func @fusion_kernel(%arg0: i32, %arg1: memref<16x512xf32, #tpu.memory_space<vmem>>, %arg2: memref<16x32xf32, #tpu.memory_space<vmem>>, %arg3: memref<1568x256xbf16, #tpu.memory_space<vmem>>, %arg4: memref<8x256xf32, #tpu.memory_space<vmem>>, %arg5: memref<16x128xf32, #tpu.memory_space<vmem>>, %arg6: memref<16x256xf32, #tpu.memory_space<vmem>>) attributes {dimension_semantics = [#tpu.dimension_semantics<parallel>], iteration_bounds = array<i64: 2>, scalar_prefetch = 0 : i64, scratch_operands = 0 : i64, tpu.core_type = #tpu.core_type<tc>, window_params = [{transform_indices = @transform_0, window_bounds = array<i64: 16, 512>}, {transform_indices = @transform_1, window_bounds = array<i64: 16, 32>}, {pipeline_mode = #tpu.pipeline_mode<synchronous>, transform_indices = @transform_2, window_bounds = array<i64: 1568, 256>}, {pipeline_mode = #tpu.pipeline_mode<synchronous>, transform_indices = @transform_3, window_bounds = array<i64: 8, 256>}, {transform_indices = @transform_4, window_bounds = array<i64: 16, 128>}, {transform_indices = @transform_5, window_bounds = array<i64: 16, 256>}]} {
    %c0 = arith.constant 0 : index
    %c0_0 = arith.constant 0 : index
    %0 = vector.load %arg1[%c0, %c0_0] : memref<16x512xf32, #tpu.memory_space<vmem>>, vector<16x512xf32>
    %1 = arith.truncf %0 : vector<16x512xf32> to vector<16x512xbf16>
    %c0_1 = arith.constant 0 : index
    %c0_2 = arith.constant 0 : index
    %2 = vector.load %arg2[%c0_1, %c0_2] : memref<16x32xf32, #tpu.memory_space<vmem>>, vector<16x32xf32>
    %3 = arith.truncf %2 : vector<16x32xf32> to vector<16x32xbf16>
    %c0_3 = arith.constant 0 : index
    %c0_4 = arith.constant 0 : index
    %4 = vector.load %arg3[%c0_3, %c0_4] : memref<1568x256xbf16, #tpu.memory_space<vmem>>, vector<512x256xbf16>
    %c512 = arith.constant 512 : index
    %c0_5 = arith.constant 0 : index
    %5 = vector.load %arg3[%c512, %c0_5] : memref<1568x256xbf16, #tpu.memory_space<vmem>>, vector<32x256xbf16>
    %c544 = arith.constant 544 : index
    %c0_6 = arith.constant 0 : index
    %6 = vector.load %arg3[%c544, %c0_6] : memref<1568x256xbf16, #tpu.memory_space<vmem>>, vector<256x256xbf16>
    %c800 = arith.constant 800 : index
    %c0_7 = arith.constant 0 : index
    %7 = vector.load %arg3[%c800, %c0_7] : memref<1568x256xbf16, #tpu.memory_space<vmem>>, vector<256x256xbf16>
    %c1056 = arith.constant 1056 : index
    %c0_8 = arith.constant 0 : index
    %8 = vector.load %arg3[%c1056, %c0_8] : memref<1568x256xbf16, #tpu.memory_space<vmem>>, vector<256x256xbf16>
    %c1312 = arith.constant 1312 : index
    %c0_9 = arith.constant 0 : index
    %9 = vector.load %arg3[%c1312, %c0_9] : memref<1568x256xbf16, #tpu.memory_space<vmem>>, vector<256x128xbf16>
    %cst = arith.constant dense<0.000000e+00> : vector<16x256xf32>
    %10 = tpu.matmul %1, %4, %cst {dimension_numbers = #tpu.dot_dimension_numbers<[1], [0], [0], [1], [0, 0, 1, 1], [], []>} : vector<16x512xbf16>, vector<512x256xbf16>, vector<16x256xf32> -> vector<16x256xf32>
    %c0_10 = arith.constant 0 : index
    %c0_11 = arith.constant 0 : index
    %11 = vector.load %arg4[%c0_10, %c0_11] : memref<8x256xf32, #tpu.memory_space<vmem>>, vector<1x256xf32>
    %12 = vector.broadcast %11 : vector<1x256xf32> to vector<16x256xf32>
    %13 = arith.addf %10, %12 : vector<16x256xf32>
    %cst_12 = arith.constant dense<0.000000e+00> : vector<16x256xf32>
    %14 = tpu.matmul %3, %5, %cst_12 {dimension_numbers = #tpu.dot_dimension_numbers<[1], [0], [0], [1], [0, 0, 1, 1], [], []>} : vector<16x32xbf16>, vector<32x256xbf16>, vector<16x256xf32> -> vector<16x256xf32>
    %c1 = arith.constant 1 : index
    %c0_13 = arith.constant 0 : index
    %15 = vector.load %arg4[%c1, %c0_13] : memref<8x256xf32, #tpu.memory_space<vmem>>, vector<1x256xf32>
    %16 = vector.broadcast %15 : vector<1x256xf32> to vector<16x256xf32>
    %17 = arith.addf %14, %16 : vector<16x256xf32>
    %18 = arith.truncf %13 : vector<16x256xf32> to vector<16x256xbf16>
    %cst_14 = arith.constant dense<0.000000e+00> : vector<16x256xf32>
    %19 = tpu.matmul %18, %6, %cst_14 {dimension_numbers = #tpu.dot_dimension_numbers<[1], [0], [0], [1], [0, 0, 1, 1], [], []>} : vector<16x256xbf16>, vector<256x256xbf16>, vector<16x256xf32> -> vector<16x256xf32>
    %20 = arith.truncf %17 : vector<16x256xf32> to vector<16x256xbf16>
    %cst_15 = arith.constant dense<0.000000e+00> : vector<16x256xf32>
    %21 = tpu.matmul %20, %7, %cst_15 {dimension_numbers = #tpu.dot_dimension_numbers<[1], [0], [0], [1], [0, 0, 1, 1], [], []>} : vector<16x256xbf16>, vector<256x256xbf16>, vector<16x256xf32> -> vector<16x256xf32>
    %22 = arith.addf %19, %21 : vector<16x256xf32>
    %c2 = arith.constant 2 : index
    %c0_16 = arith.constant 0 : index
    %23 = vector.load %arg4[%c2, %c0_16] : memref<8x256xf32, #tpu.memory_space<vmem>>, vector<1x256xf32>
    %24 = vector.broadcast %23 : vector<1x256xf32> to vector<16x256xf32>
    %25 = arith.addf %22, %24 : vector<16x256xf32>
    %cst_17 = arith.constant 0.000000e+00 : f32
    %26 = vector.broadcast %cst_17 : f32 to vector<16x256xf32>
    %27 = arith.maximumf %25, %26 : vector<16x256xf32>
    %28 = arith.truncf %27 : vector<16x256xf32> to vector<16x256xbf16>
    %cst_18 = arith.constant dense<0.000000e+00> : vector<16x256xf32>
    %29 = tpu.matmul %28, %8, %cst_18 {dimension_numbers = #tpu.dot_dimension_numbers<[1], [0], [0], [1], [0, 0, 1, 1], [], []>} : vector<16x256xbf16>, vector<256x256xbf16>, vector<16x256xf32> -> vector<16x256xf32>
    %c3 = arith.constant 3 : index
    %c0_19 = arith.constant 0 : index
    %30 = vector.load %arg4[%c3, %c0_19] : memref<8x256xf32, #tpu.memory_space<vmem>>, vector<1x256xf32>
    %31 = vector.broadcast %30 : vector<1x256xf32> to vector<16x256xf32>
    %32 = arith.addf %29, %31 : vector<16x256xf32>
    %33 = arith.negf %32 : vector<16x256xf32>
    %34 = math.exp %33 : vector<16x256xf32>
    %cst_20 = arith.constant 1.000000e+00 : f32
    %35 = vector.broadcast %cst_20 : f32 to vector<16x256xf32>
    %36 = arith.addf %35, %34 : vector<16x256xf32>
    %37 = arith.divf %35, %36 : vector<16x256xf32>
    %38 = arith.subf %13, %17 : vector<16x256xf32>
    %39 = arith.mulf %37, %38 : vector<16x256xf32>
    %40 = arith.addf %17, %39 : vector<16x256xf32>
    %41 = arith.truncf %40 : vector<16x256xf32> to vector<16x256xbf16>
    %cst_21 = arith.constant dense<0.000000e+00> : vector<16x128xf32>
    %42 = tpu.matmul %41, %9, %cst_21 {dimension_numbers = #tpu.dot_dimension_numbers<[1], [0], [0], [1], [0, 0, 1, 1], [], []>} : vector<16x256xbf16>, vector<256x128xbf16>, vector<16x128xf32> -> vector<16x128xf32>
    %c4 = arith.constant 4 : index
    %c0_22 = arith.constant 0 : index
    %43 = vector.load %arg4[%c4, %c0_22] : memref<8x256xf32, #tpu.memory_space<vmem>>, vector<1x128xf32>
    %44 = vector.broadcast %43 : vector<1x128xf32> to vector<16x128xf32>
    %45 = arith.addf %42, %44 : vector<16x128xf32>
    %c0_23 = arith.constant 0 : index
    %c0_24 = arith.constant 0 : index
    %46 = vector.load %arg5[%c0_23, %c0_24] : memref<16x128xf32, #tpu.memory_space<vmem>>, vector<16x128xf32>
    tpu.vector_store %arg5[%c0_23, %c0_24], %45 {strides = array<i32>} : memref<16x128xf32, #tpu.memory_space<vmem>>, vector<16x128xf32>,
    %c0_25 = arith.constant 0 : index
    %c0_26 = arith.constant 0 : index
    %47 = vector.load %arg6[%c0_25, %c0_26] : memref<16x256xf32, #tpu.memory_space<vmem>>, vector<16x256xf32>
    tpu.vector_store %arg6[%c0_25, %c0_26], %40 {strides = array<i32>} : memref<16x256xf32, #tpu.memory_space<vmem>>, vector<16x256xf32>,
    return
  }
  func.func @transform_0(%arg0: i32) -> (i32, i32) {
    %c0_i32 = arith.constant 0 : i32
    %c0_i32_0 = arith.constant 0 : i32
    return %arg0, %c0_i32 : i32, i32
  }
  func.func @transform_1(%arg0: i32) -> (i32, i32) {
    %c0_i32 = arith.constant 0 : i32
    %c0_i32_0 = arith.constant 0 : i32
    return %arg0, %c0_i32 : i32, i32
  }
  func.func @transform_2(%arg0: i32) -> (i32, i32) {
    %c0_i32 = arith.constant 0 : i32
    %c0_i32_0 = arith.constant 0 : i32
    %c0_i32_1 = arith.constant 0 : i32
    return %c0_i32, %c0_i32_0 : i32, i32
  }
  func.func @transform_3(%arg0: i32) -> (i32, i32) {
    %c0_i32 = arith.constant 0 : i32
    %c0_i32_0 = arith.constant 0 : i32
    %c0_i32_1 = arith.constant 0 : i32
    return %c0_i32, %c0_i32_0 : i32, i32
  }
  func.func @transform_4(%arg0: i32) -> (i32, i32) {
    %c0_i32 = arith.constant 0 : i32
    %c0_i32_0 = arith.constant 0 : i32
    return %arg0, %c0_i32 : i32, i32
  }
  func.func @transform_5(%arg0: i32) -> (i32, i32) {
    %c0_i32 = arith.constant 0 : i32
    %c0_i32_0 = arith.constant 0 : i32
    return %arg0, %c0_i32 : i32, i32
  }
}

</mosaic_0001>

<bundles_post_ra>
// kernel: tpu_custom_call.1
= control target key start
LH: loop header
LB: loop body
LE: loop exit
PB: predicated region body
PF: predicated region fallthrough
CT: control target
= control target key end

     0   :  { %s3958_s0 = inlined_call_operand.hbm [shape: f32[24,512], index: 0, kind: input, shape index: {}]   ;;  %s3959_s1 = inlined_call_operand.hbm [shape: f32[24,32], index: 1, kind: input, shape index: {}]   ;;  %s3960_s2 = inlined_call_operand.hbm [shape: bf16[1568,256], index: 2, kind: input, shape index: {}]   ;;  %s3961_s3 = inlined_call_operand.hbm [shape: f32[8,256], index: 3, kind: input, shape index: {}]   ;;  %s3962_s4 = inlined_call_operand.hbm [shape: f32[24,128], index: 4, kind: output, shape index: {0}]   ;;  %s3963_s5 = inlined_call_operand.hbm [shape: f32[24,256], index: 5, kind: output, shape index: {1}]  }
   0x1   :  { %3968 = sst [smem:[#allocation19_spill]] %s3960_s2 }
   0x2   :  { %3969 = sst [smem:[#allocation20_spill]] %s3961_s3 }
   0x3   :  { %11 = vsyncpa [#allocation3], 0 }
   0x4   :  { %13 = vsyncpa [#allocation3 + $0x1], 0 }
   0x5   :  { %14 = vsyncpa [#allocation6], 0 }
   0x6   :  { %16 = vsyncpa [#allocation6 + $0x1], 0 }
   0x7   :  { %17 = vsyncpa [#allocation9], 0 }
   0x8   :  { %18 = vsyncpa [#allocation4], 0 }
   0x9   :  { %20 = vsyncpa [#allocation4 + $0x1], 0 }
   0xa   :  { %21 = vsyncpa [#allocation12], 0 }
   0xb   :  { %23 = vsyncpa [#allocation12 + $0x1], 0  ;;  %s3544_s18 = smov 0   ;;  %s3546_s19 = smov 0  }
   0xc   :  { %s3548_s20 = smov 0   ;;  %s3550_s21 = smov 0  }
   0xd LB: > { %s3565_s22 = sadd.s32 4294967295, %s3496_s21   ;;  %s2175_s23 = sadd.s32 4294967294, %s3496_s21   ;;  %s3496_s21 = sphi %s3550_s21, %s3996_s21   ;;  %s3492_s20 = sphi %s3548_s20, %s3995_s20   ;;  %s3488_s19 = sphi %s3546_s19, %s3994_s19   ;;  %s3484_s18 = sphi %s3544_s18, %s3993_s18  }
   0xe   : > { %s3569_s24 = sadd.s32 1, %s3496_s21   ;;  %s36_s25 = sadd.s32 1, %s3492_s20 }
   0xf   : > { %s33_s26 = ssub.s32 %s3496_s21, %s3569_s24  ;;  %p43_p0 = scmp.ne.s32.totalorder %s3492_s20, %s3488_s19 }
  0x10   : > { %p34_p1 = scmp.eq.s32.totalorder %s33_s26, 0  ;;  %p44_p2 = scmp.eq.s32.totalorder %s3496_s21, 0 }
  0x11   : > { %p49_p3 = scmp.ne.s32.totalorder %s3488_s19, %s3484_s18  ;;  %p3966_p4 = scmp.eq.s32.totalorder %s3565_s22, 0 }
  0x12   : > { %s3581_s27 = scalar_select %p34_p1, %s3492_s20, %s36_s25  }
  0x13   : > { %p3583_p5 = por %p44_p2, %p43_p0  ;;  %p3589_p6 = por %p3966_p4, %p49_p3 }
  0x14   : > { %p141_p7 = scmp.eq.s32.totalorder %s3565_s22, 1  ;;  %p147_p8 = scmp.eq.s32.totalorder %s2175_s23, 1 }
  0x15   : > { %p2176_p9 = scmp.ge.s32.totalorder %s3496_s21, 1  ;;  %p180_p10 = scmp.lt.s32.totalorder %s3496_s21, 3 }
  0x16   : > { %p3596_p11 = por %p141_p7, %p43_p0  ;;  %p3600_p12 = por %p147_p8, %p49_p3 }
  0x17   : > { %p3604_p13 = pnand %p2176_p9, %p180_p10  ;;  %s3975_s2 = sld [smem:[#allocation19_spill]] }
  0x18   : > { %s3972_s30 = scalar_select %p3596_p11, 1, 0 }
  0x19   : > { %s3973_s6 = scalar_select %p3600_p12, 1, 0 }
  0x1a   : > { %p3147_p1 = pneg %p3604_p13  ;;  %s3498_s11 = smov [#allocation7]  }
  0x1b   : > { %s193_s12 = sshll.u32 %s3498_s11, 4  ;;  %s3976_s3 = sld [smem:[#allocation20_spill]]  ;;  %s194_s12 = int_to_ptr.vmem [resolvable:$true] %s193_s12 }
  0x1c   : > { %p3148_p0 = pnand %p3147_p1, %p3966_p4  ;;  %s3499_s16 = smov 128  }
  0x1d   : > { %s191_s10 = sshll.u32 %s3975_s2, 4  ;;  %s3500_s17 = smov 8   ;;  %s192_s10 = int_to_ptr.hbm [resolvable:$true] %s191_s10 }
  0x1e   : > { %3150 = dma.hbm_to_vmem [thread:$0]  (!%p3148_p0), %s192_s10, 25088, %s194_s12, [#allocation6], %s3499_s16, %s3499_s16, %s3500_s17  }
  0x1f   : > { %s3501_s23 = smov [#allocation8]   ;;  %p3964_p2 = scmp.ge.s32.totalorder %s3496_s21, 2 }
  0x20   : > { %s208_s25 = sshll.u32 %s3501_s23, 4  ;;  %s209_s25 = int_to_ptr.vmem [resolvable:$true] %s208_s25 }
  0x21   : > { %s206_s15 = sshll.u32 %s3976_s3, 4  ;;  %215 = sbr.rel (%p3964_p2) target bundleno = 111 (0x6f), region = 24  ;;  %s207_s15 = int_to_ptr.hbm [resolvable:$true] %s206_s15 }
  0x22   : > { %3153 = dma.hbm_to_vmem [thread:$0]  (!%p3148_p0), %s207_s15, 256, %s209_s25, [#allocation9]  }
  0x26   : > { %218 = sbr.rel (!%p3583_p5) target bundleno = 75 (0x4b), region = 28  ;;  %s219_s26 = sand.u32 (%p3583_p5), 1, %s3492_s20  }
  0x27   : > { %s2181_s8 = sshll.u32 (%p3583_p5), %s3496_s21, 1  ;;  %s2180_s9 = sshll.u32 (%p3583_p5), %s219_s26, 6 }
  0x28   : > { %s225_s11 = ssub.s32 (%p3583_p5), 3, %s2181_s8  ;;  %s3628_s14 = scalar_lea.sflag (%p3583_p5), [#allocation3], %s219_s26 }
  0x29   : > { %p226_p3 = scmp.lt.s32.totalorder (%p3583_p5), %s225_s11, 2  ;;  %s223_s15 = scalar_lea.vmem (%p3583_p5), [#allocation2], %s2180_s9 }
  0x2b   : > { %s3998_s11 = smov (!%p226_p3, %s225_s11), 2 }
  0x2c   : > { %s2947_s10 = sshll.u32 %s3998_s11, 5 }
  0x2d   : > { %s230_s12 = ssub.s32 64, %s2947_s10 }
  0x2e   : > { %s231_s13 = sshll.u32 %s230_s12, 4 }
  0x2f   : > { %232 = vsyncadd %s3628_s14, %s231_s13  ;;  %p3631_p7 = scmp.ne.s32.totalorder %s2947_s10, 0  ;;  %s2949_s17 = sshll.u32 %s3496_s21, 6 }
  0x30   : > { %s236_s8 = scalar_lea.hbm %s3958_s0, %s2949_s17  ;;  %s3639_s2 = sshll.u32 %s223_s15, 4  ;;  %s241_s2 = int_to_ptr.vmem [resolvable:$true] %s3639_s2 }
  0x31   : > { %s238_s26 = sshll.u32 %s236_s8, 4  ;;  %s3965_s9 = sshll.u32 %s3998_s11, 9  ;;  %s3642_s26 = int_to_ptr.hbm [resolvable:$true] %s238_s26 }
  0x32   : > { %s3286_s12 = sshra.s32 %s3642_s26, 4  ;;  %s3288_s10 = sshrl.u32 %s3965_s9, 4  ;;  %s3287_s12 = int_to_ptr.hbm [resolvable:$true] %s3286_s12 }
  0x33   : > { %s3293_s13 = scalar_lea.hbm %s3287_s12, %s3288_s10  ;;  %s3297_s15 = scalar_lea.hbm %s3958_s0, 96 }
  0x34   : > { %p3294_p8 = scmp.ne.s32.totalorder %s3287_s12, %s3293_s13  ;;  %p3298_p1 = scmp.lt.s32.totalorder %s3287_s12, %s3958_s0 }
  0x35   : > { %p3299_p0 = scmp.lt.s32.totalorder %s3297_s15, %s3293_s13 }
  0x36   : > { %p3295_p9 = pnand %p3294_p8, %p3631_p7 }
  0x37   : > { %p3300_p3 = por %p3299_p0, %p3298_p1 }
  0x38   : > { %p3296_p10 = pneg %p3295_p9 }
  0x3a   : > { %p3301_p2 = pnand %p3300_p3, %p3296_p10 }
  0x3c   : > { %3304 = shalt.err (!%p3301_p2)
}
  0x3d   : > { %s3305_s9 = sshra.s32 %s241_s2, 4  ;;  %s3502_s23 = smov [#allocation2]   ;;  %s3306_s9 = int_to_ptr.vmem [resolvable:$true] %s3305_s9 }
  0x3e   : > { %s3312_s3 = scalar_lea.vmem %s3306_s9, %s3288_s10  ;;  %s3316_s17 = scalar_lea.vmem %s3502_s23, 128 }
  0x3f   : > { %p3313_p8 = scmp.ne.s32.totalorder %s3306_s9, %s3312_s3  ;;  %p3318_p12 = scmp.lt.s32.totalorder %s3316_s17, %s3312_s3 }
  0x41   : > { %p3314_p9 = pnand %p3313_p8, %p3631_p7 }
  0x43   : > { %p3315_p4 = pneg %p3314_p9 }
  0x45   : > { %p3320_p11 = pnand %p3318_p12, %p3315_p4 }
  0x47   : > { %3323 = shalt.err (!%p3320_p11)
}
  0x48   : > { %s3503_s12 = smov 512   ;;  %s3504_s13 = smov 32  }
  0x49   : > { %s3978_s15 = sshll.u32 %s3998_s11, 9 }
  0x4a   : > { %246 = dma.hbm_to_vmem [thread:$0]  (%p3631_p7), %s3642_s26, %s3978_s15, %s241_s2, %s3628_s14, %s3503_s12, %s3503_s12, %s3504_s13  }
  0x4b PF: > { %249 = sbr.rel (!%p3583_p5) target bundleno = 111 (0x6f), region = 32  ;;  %s250_s3 = sand.u32 (%p3583_p5), 1, %s3496_s21  }
  0x4c   : > { %s252_s9 = sand.u32 (%p3583_p5), 1, %s3492_s20   ;;  %s2190_s25 = sshll.u32 (%p3583_p5), %s3496_s21, 1 }
  0x4d   : > { %s2189_s10 = sshll.u32 (%p3583_p5), %s252_s9, 4  ;;  %s256_s8 = ssub.s32 (%p3583_p5), 3, %s2190_s25 }
  0x4e   : > { %p257_p4 = scmp.lt.s32.totalorder (%p3583_p5), %s256_s8, 2  ;;  %s3676_s2 = scalar_lea.sflag (%p3583_p5), [#allocation6], %s250_s3 }
  0x4f   : > { %s254_s28 = scalar_lea.vmem (%p3583_p5), [#allocation5], %s2189_s10 }
  0x50   : > { %s4000_s8 = smov (!%p257_p4, %s256_s8), 2 }
  0x51   : > { %s2191_s16 = sshll.u32 %s4000_s8, 3 }
  0x52   : > { %s260_s23 = ssub.s32 16, %s2191_s16 }
  0x53   : > { %s261_s11 = sshll.u32 %s260_s23, 4 }
  0x54   : > { %262 = vsyncadd %s3676_s2, %s261_s11  ;;  %p3679_p5 = scmp.ne.s32.totalorder %s2191_s16, 0  ;;  %s2950_s26 = sshll.u32 %s3496_s21, 4 }
  0x55   : > { %s265_s13 = scalar_lea.hbm %s3959_s1, %s2950_s26  ;;  %s3687_s15 = sshll.u32 %s254_s28, 4  ;;  %s270_s15 = int_to_ptr.vmem [resolvable:$true] %s3687_s15 }
  0x56   : > { %s267_s3 = sshll.u32 %s265_s13, 4  ;;  %s2195_s9 = sshll.u32 %s4000_s8, 7  ;;  %s3690_s3 = int_to_ptr.hbm [resolvable:$true] %s267_s3 }
  0x57   : > { %s3325_s10 = sshra.s32 %s3690_s3, 4  ;;  %s3327_s25 = sshrl.u32 %s2195_s9, 4  ;;  %s3326_s10 = int_to_ptr.hbm [resolvable:$true] %s3325_s10 }
  0x58   : > { %s3332_s16 = scalar_lea.hbm %s3326_s10, %s3327_s25  ;;  %s3336_s28 = scalar_lea.hbm %s3959_s1, 24 }
  0x59   : > { %p3333_p11 = scmp.ne.s32.totalorder %s3326_s10, %s3332_s16  ;;  %p3337_p7 = scmp.lt.s32.totalorder %s3326_s10, %s3959_s1 }
  0x5a   : > { %p3338_p10 = scmp.lt.s32.totalorder %s3336_s28, %s3332_s16 }
  0x5b   : > { %p3334_p12 = pnand %p3333_p11, %p3679_p5 }
  0x5c   : > { %p3339_p1 = por %p3338_p10, %p3337_p7 }
  0x5d   : > { %p3335_p2 = pneg %p3334_p12 }
  0x5f   : > { %p3340_p0 = pnand %p3339_p1, %p3335_p2 }
  0x61   : > { %3343 = shalt.err (!%p3340_p0)
}
  0x62   : > { %s3344_s12 = sshra.s32 %s270_s15, 4  ;;  %s3505_s23 = smov [#allocation5]   ;;  %s3345_s12 = int_to_ptr.vmem [resolvable:$true] %s3344_s12 }
  0x63   : > { %s3351_s13 = scalar_lea.vmem %s3345_s12, %s3327_s25  ;;  %s3355_s11 = scalar_lea.vmem %s3505_s23, 32 }
  0x64   : > { %p3352_p3 = scmp.ne.s32.totalorder %s3345_s12, %s3351_s13  ;;  %p3357_p4 = scmp.lt.s32.totalorder %s3355_s11, %s3351_s13 }
  0x66   : > { %p3353_p8 = pnand %p3352_p3, %p3679_p5 }
  0x68   : > { %p3354_p9 = pneg %p3353_p8 }
  0x6a   : > { %p3359_p11 = pnand %p3357_p4, %p3354_p9 }
  0x6c   : > { %3362 = shalt.err (!%p3359_p11)
}
  0x6d   : > { %s3506_s10 = smov 128   ;;  %s3507_s16 = smov 8  }
  0x6e   : > { %275 = dma.hbm_to_vmem [thread:$0]  (%p3679_p5), %s3690_s3, %s2195_s9, %s270_s15, %s3676_s2, %s3506_s10, %s3506_s10, %s3507_s16  }
  0x6f PF: > { %281 = sbr.rel (%p3604_p13) target bundleno = 907 (0x38b), region = 36  ;;  %s3719_s25 = sand.u32 (!%p3604_p13), 1, %s3488_s19  }
  0x70   : > { %s2197_s28 = sshll.u32 (!%p3604_p13), %s3719_s25, 6  ;;  %s284_s26 = scalar_lea.sflag (!%p3604_p13), [#allocation3], %s3719_s25 }
  0x71   : > { %s3723_s17 = scalar_lea.vmem (!%p3604_p13), [#allocation2], %s2197_s28 }
  0x74   : > { %3459 = dma.done.wait (%p3589_p6), %s284_s26, 1024  }
  0x75   : > { %3461 = vsyncadd (%p3589_p6), %s284_s26, 4294966272  ;;  %s293_s7 = sand.u32 1, %s3565_s22   ;;  %s2198_s8 = sshll.u32 %s3719_s25, 4 }
  0x76   : > { %s294_s2 = scalar_lea.sflag [#allocation6], %s293_s7  ;;  %s3733_s14 = scalar_lea.vmem [#allocation5], %s2198_s8 }
  0x77   : > { %3463 = dma.done.wait (%p3589_p6), %s294_s2, 256  }
  0x78   : > { %3465 = vsyncadd (%p3589_p6), %s294_s2, 4294967040  ;;  %p3980_p13 = scmp.eq.s32.totalorder %s3565_s22, 0 }
  0x7a   : > { %3467 = dma.done.wait (%p3980_p13), [#allocation6], 25088   ;;  %p3981_p5 = pmov %p3980_p13 }
  0x7c   : > { %3469 = vsyncadd (%p3981_p5), [#allocation6], 4294942208  ;;  %p3982_p12 = pmov %p3981_p5 }
  0x7d   : > { %p3983_p2 = pmov %p3981_p5 }
  0x7e   : > { %3471 = dma.done.wait (%p3982_p12), [#allocation9], 256  }
  0x7f   : > { %3473 = vsyncadd (%p3983_p2), [#allocation9], 4294967040  ;;  %v2261_v0 = vld [vmem:[#allocation7 + $0x70] sm:$0xf]  ;;  %v2966_v1 = vld [vmem:[#allocation7 + $0x74] sm:$0xf0] }
  0x80   : > { %v2325_v2 = vld [vmem:[#allocation7 + $0xf0] sm:$0xf]  ;;  %v2262_v3 = vor.u32 %v2966_v1, %v2261_v0  ;;  %v2982_v4 = vld [vmem:[#allocation7 + $0xf4] sm:$0xf0]  ;;  %v2253_v11 = vld [vmem:[#allocation7 + $0x60] sm:$0xf] }
  0x81   : > { %v2389_v5 = vld [vmem:[#allocation7 + $0x170] sm:$0xf]  ;;  %v2998_v6 = vld [vmem:[#allocation7 + $0x174] sm:$0xf0]  ;;  %v2326_v7 = vor.u32 %v2982_v4, %v2325_v2  ;;  %v2964_v13 = vld [vmem:[#allocation7 + $0x64] sm:$0xf0] }
  0x82   : > { %v2390_v8 = vor.u32 %v2998_v6, %v2389_v5  ;;  %v2453_v9 = vld [vmem:[#allocation7 + $0x1f0] sm:$0xf]  ;;  %v3014_v10 = vld [vmem:[#allocation7 + $0x1f4] sm:$0xf0]  ;;  %905 = vmatpush.bf16.msra.mxu0 %v2262_v3  ;;  %v2317_v14 = vld [vmem:[#allocation7 + $0xe0] sm:$0xf]  ;;  %v2254_v16 = vor.u32 %v2964_v13, %v2253_v11 }
  0x83   : > { %v2454_v12 = vor.u32 %v3014_v10, %v2453_v9  ;;  %v2980_v15 = vld [vmem:[#allocation7 + $0xe4] sm:$0xf0]  ;;  %919 = vmatpush.bf16.msra.mxu1 %v2326_v7  ;;  %v2381_v18 = vld [vmem:[#allocation7 + $0x160] sm:$0xf]  ;;  %v2245_v23 = vld [vmem:[#allocation7 + $0x50] sm:$0xf] }
  0x84   : > { %933 = vmatpush.bf16.msra.mxu2 %v2390_v8  ;;  %v2318_v17 = vor.u32 %v2980_v15, %v2317_v14  ;;  %v2996_v19 = vld [vmem:[#allocation7 + $0x164] sm:$0xf0]  ;;  %v2445_v20 = vld [vmem:[#allocation7 + $0x1e0] sm:$0xf]  ;;  %v2962_v24 = vld [vmem:[#allocation7 + $0x54] sm:$0xf0] }
  0x85   : > { %947 = vmatpush.bf16.msra.mxu3 %v2454_v12  ;;  %v2382_v21 = vor.u32 %v2996_v19, %v2381_v18  ;;  %v3012_v22 = vld [vmem:[#allocation7 + $0x1e4] sm:$0xf0]  ;;  %v2309_v26 = vld [vmem:[#allocation7 + $0xd0] sm:$0xf]  ;;  %v2978_v27 = vld [vmem:[#allocation7 + $0xd4] sm:$0xf0]  ;;  %v2246_v29 = vor.u32 %v2962_v24, %v2245_v23 }
  0x86   : > { %v2446_v25 = vor.u32 %v3012_v22, %v2445_v20  ;;  %v2373_v28 = vld [vmem:[#allocation7 + $0x150] sm:$0xf]  ;;  %906 = vmatpush.bf16.msra.mxu0 %v2254_v16  ;;  %v2994_v30 = vld [vmem:[#allocation7 + $0x154] sm:$0xf0]  ;;  %v2310_v33 = vor.u32 %v2978_v27, %v2309_v26  ;;  %v2237_v35 = vld [vmem:[#allocation7 + $0x40] sm:$0xf] }
  0x87   : > { %v2437_v31 = vld [vmem:[#allocation7 + $0x1d0] sm:$0xf]  ;;  %v3010_v32 = vld [vmem:[#allocation7 + $0x1d4] sm:$0xf0]  ;;  %920 = vmatpush.bf16.msra.mxu1 %v2318_v17  ;;  %v2374_v34 = vor.u32 %v2994_v30, %v2373_v28  ;;  %v2960_v36 = vld [vmem:[#allocation7 + $0x44] sm:$0xf0] }
  0x88   : > { %934 = vmatpush.bf16.msra.mxu2 %v2382_v21  ;;  %v2301_v37 = vld [vmem:[#allocation7 + $0xc0] sm:$0xf]  ;;  %v2438_v38 = vor.u32 %v3010_v32, %v2437_v31  ;;  %v2976_v39 = vld [vmem:[#allocation7 + $0xc4] sm:$0xf0]  ;;  %v2238_v44 = vor.u32 %v2960_v36, %v2237_v35  ;;  %v2229_v47 = vld [vmem:[#allocation7 + $0x30] sm:$0xf] }
  0x89   : > { %948 = vmatpush.bf16.msra.mxu3 %v2446_v25  ;;  %v2365_v40 = vld [vmem:[#allocation7 + $0x140] sm:$0xf]  ;;  %v2992_v41 = vld [vmem:[#allocation7 + $0x144] sm:$0xf0]  ;;  %v2302_v45 = vor.u32 %v2976_v39, %v2301_v37  ;;  %v2958_v48 = vld [vmem:[#allocation7 + $0x34] sm:$0xf0] }
  0x8a   : > { %v2429_v42 = vld [vmem:[#allocation7 + $0x1c0] sm:$0xf]  ;;  %v3008_v43 = vld [vmem:[#allocation7 + $0x1c4] sm:$0xf0]  ;;  %907 = vmatpush.bf16.msra.mxu0 %v2246_v29  ;;  %v2366_v46 = vor.u32 %v2992_v41, %v2365_v40  ;;  %v2293_v49 = vld [vmem:[#allocation7 + $0xb0] sm:$0xf]  ;;  %v2230_v56 = vor.u32 %v2958_v48, %v2229_v47 }
  0x8b   : > { %921 = vmatpush.bf16.msra.mxu1 %v2310_v33  ;;  %v2430_v50 = vor.u32 %v3008_v43, %v2429_v42  ;;  %v2974_v51 = vld [vmem:[#allocation7 + $0xb4] sm:$0xf0]  ;;  %v2357_v52 = vld [vmem:[#allocation7 + $0x130] sm:$0xf]  ;;  %v2221_v59 = vld [vmem:[#allocation7 + $0x20] sm:$0xf] }
  0x8c   : > { %935 = vmatpush.bf16.msra.mxu2 %v2374_v34  ;;  %v2990_v53 = vld [vmem:[#allocation7 + $0x134] sm:$0xf0]  ;;  %v2421_v54 = vld [vmem:[#allocation7 + $0x1b0] sm:$0xf]  ;;  %v2294_v57 = vor.u32 %v2974_v51, %v2293_v49  ;;  %v2956_v60 = vld [vmem:[#allocation7 + $0x24] sm:$0xf0] }
  0x8d   : > { %949 = vmatpush.bf16.msra.mxu3 %v2438_v38  ;;  %v3006_v55 = vld [vmem:[#allocation7 + $0x1b4] sm:$0xf0]  ;;  %v2358_v58 = vor.u32 %v2990_v53, %v2357_v52  ;;  %v2285_v61 = vld [vmem:[#allocation7 + $0xa0] sm:$0xf]  ;;  %v2972_v63 = vld [vmem:[#allocation7 + $0xa4] sm:$0xf0]  ;;  %v2222_v4 = vor.u32 %v2956_v60, %v2221_v59 }
  0x8e   : > { %908 = vmatpush.bf16.msra.mxu0 %v2238_v44  ;;  %v2422_v62 = vor.u32 %v3006_v55, %v2421_v54  ;;  %v2349_v0 = vld [vmem:[#allocation7 + $0x120] sm:$0xf]  ;;  %v2988_v1 = vld [vmem:[#allocation7 + $0x124] sm:$0xf0]  ;;  %v2286_v5 = vor.u32 %v2972_v63, %v2285_v61  ;;  %v2213_v7 = vld [vmem:[#allocation7 + $0x10] sm:$0xf] }
  0x8f   : > { %922 = vmatpush.bf16.msra.mxu1 %v2302_v45  ;;  %v2413_v2 = vld [vmem:[#allocation7 + $0x1a0] sm:$0xf]  ;;  %v3004_v3 = vld [vmem:[#allocation7 + $0x1a4] sm:$0xf0]  ;;  %v2350_v6 = vor.u32 %v2988_v1, %v2349_v0  ;;  %v2954_v8 = vld [vmem:[#allocation7 + $0x14] sm:$0xf0] }
  0x90   : > { %936 = vmatpush.bf16.msra.mxu2 %v2366_v46  ;;  %v2277_v9 = vld [vmem:[#allocation7 + $0x90] sm:$0xf]  ;;  %v2414_v10 = vor.u32 %v3004_v3, %v2413_v2  ;;  %v2970_v11 = vld [vmem:[#allocation7 + $0x94] sm:$0xf0]  ;;  %v2205_v16 = vld [vmem:[#allocation7] sm:$0xf]  ;;  %v2214_v17 = vor.u32 %v2954_v8, %v2213_v7 }
  0x91   : > { %950 = vmatpush.bf16.msra.mxu3 %v2430_v50  ;;  %v2341_v12 = vld [vmem:[#allocation7 + $0x110] sm:$0xf]  ;;  %v2986_v13 = vld [vmem:[#allocation7 + $0x114] sm:$0xf0]  ;;  %v2952_v18 = vld [vmem:[#allocation7 + $0x4] sm:$0xf0]  ;;  %v2278_v21 = vor.u32 %v2970_v11, %v2277_v9 }
  0x92   : > { %909 = vmatpush.bf16.msra.mxu0 %v2230_v56  ;;  %v2405_v14 = vld [vmem:[#allocation7 + $0x190] sm:$0xf]  ;;  %v3002_v15 = vld [vmem:[#allocation7 + $0x194] sm:$0xf0]  ;;  %v2269_v19 = vld [vmem:[#allocation7 + $0x80] sm:$0xf]  ;;  %v2342_v22 = vor.u32 %v2986_v13, %v2341_v12  ;;  %v2206_v33 = vor.u32 %v2952_v18, %v2205_v16 }
  0x93   : > { %923 = vmatpush.bf16.msra.mxu1 %v2294_v57  ;;  %v2968_v20 = vld [vmem:[#allocation7 + $0x84] sm:$0xf0]  ;;  %v2333_v23 = vld [vmem:[#allocation7 + $0x100] sm:$0xf]  ;;  %v2965_v25 = vld [vmem:[#allocation7 + $0x74] sm:$0xf]  ;;  %v2406_v26 = vor.u32 %v3002_v15, %v2405_v14 }
  0x94   : > { %937 = vmatpush.bf16.msra.mxu2 %v2358_v58  ;;  %v2984_v24 = vld [vmem:[#allocation7 + $0x104] sm:$0xf0]  ;;  %v2263_v27 = vld [vmem:[#allocation7 + $0x78] sm:$0xf0]  ;;  %v2981_v28 = vld [vmem:[#allocation7 + $0xf4] sm:$0xf]  ;;  %v2270_v37 = vor.u32 %v2968_v20, %v2269_v19 }
  0x95   : > { %951 = vmatpush.bf16.msra.mxu3 %v2422_v62  ;;  %v2327_v29 = vld [vmem:[#allocation7 + $0xf8] sm:$0xf0]  ;;  %v2997_v30 = vld [vmem:[#allocation7 + $0x174] sm:$0xf]  ;;  %v2397_v32 = vld [vmem:[#allocation7 + $0x180] sm:$0xf]  ;;  %v2334_v38 = vor.u32 %v2984_v24, %v2333_v23  ;;  %v2266_v44 = vor.u32 %v2965_v25, %v2263_v27 }
  0x96   : > { %910 = vmatpush.bf16.msra.mxu0 %v2222_v4  ;;  %v2391_v31 = vld [vmem:[#allocation7 + $0x178] sm:$0xf0]  ;;  %v3000_v34 = vld [vmem:[#allocation7 + $0x184] sm:$0xf0]  ;;  %v3013_v35 = vld [vmem:[#allocation7 + $0x1f4] sm:$0xf]  ;;  %v2330_v45 = vor.u32 %v2981_v28, %v2327_v29 }
  0x97   : > { %924 = vmatpush.bf16.msra.mxu1 %v2286_v5  ;;  %v2455_v36 = vld [vmem:[#allocation7 + $0x1f8] sm:$0xf0]  ;;  %v2963_v39 = vld [vmem:[#allocation7 + $0x64] sm:$0xf]  ;;  %v2255_v40 = vld [vmem:[#allocation7 + $0x68] sm:$0xf0]  ;;  %v2394_v49 = vor.u32 %v2997_v30, %v2391_v31  ;;  %v2398_v50 = vor.u32 %v3000_v34, %v2397_v32 }
  0x98   : > { %938 = vmatpush.bf16.msra.mxu2 %v2350_v6  ;;  %v2979_v41 = vld [vmem:[#allocation7 + $0xe4] sm:$0xf]  ;;  %v370_v42 = vld [vmem:[%s3723_s17 + $0x10] sm:$0xff]  ;;  %v2319_v46 = vld [vmem:[#allocation7 + $0xe8] sm:$0xf0]  ;;  %v2458_v54 = vor.u32 %v3013_v35, %v2455_v36  ;;  %v2258_v63 = vor.u32 %v2963_v39, %v2255_v40  ;;  %vm1044_vm0 = vcmask 261120  }
  0x99   : > { %952 = vmatpush.bf16.msra.mxu3 %v2414_v10  ;;  %v374_v43 = vld [vmem:[%s3723_s17 + $0x30] sm:$0xff]  ;;  %v368_v47 = vld [vmem:[%s3723_s17] sm:$0xff]  ;;  %v2383_v52 = vld [vmem:[#allocation7 + $0x168] sm:$0xf0]  ;;  %v2322_v0 = vor.u32 %v2979_v41, %v2319_v46  ;;  %s2202_s29 = sshll.u32 %s3719_s25, 5  ;;  %s337_s3 = scalar_lea.vmem [#allocation10], %s2198_s8 }
  0x9a   : > { %911 = vmatpush.bf16.msra.mxu0 %v2214_v17  ;;  %v372_v48 = vld [vmem:[%s3723_s17 + $0x20] sm:$0xff]  ;;  %v369_v53 = vld [vmem:[%s3723_s17 + $0x8] sm:$0xff]  ;;  %v3752_v55 = vpack.c.bf16 %v374_v43, %v370_v42  ;;  %v371_v56 = vld [vmem:[%s3723_s17 + $0x18] sm:$0xff]  ;;  %s3832_s15 = scalar_lea.vmem [#allocation11], %s2202_s29  ;;  %s1974_s9 = scalar_lea.sflag [#allocation4], %s3719_s25 }
  0x9b   : > { %925 = vmatpush.bf16.msra.mxu1 %v2278_v21  ;;  %v2995_v51 = vld [vmem:[#allocation7 + $0x164] sm:$0xf]  ;;  %v375_v57 = vld [vmem:[%s3723_s17 + $0x38] sm:$0xff]  ;;  %v373_v58 = vld [vmem:[%s3723_s17 + $0x28] sm:$0xff]  ;;  %v3757_v61 = vpack.c.bf16 %v372_v48, %v368_v47  ;;  %p3984_p6 = scmp.ne.s32.totalorder %s3972_s30, 0 }
  0x9c   : > { %939 = vmatpush.bf16.msra.mxu2 %v2342_v22  ;;  %v3011_v59 = vld [vmem:[#allocation7 + $0x1e4] sm:$0xf]  ;;  %v2447_v60 = vld [vmem:[#allocation7 + $0x1e8] sm:$0xf0]  ;;  %v3759_v62 = vpack.c.bf16 %v373_v58, %v369_v53  ;;  %v2961_v1 = vld [vmem:[#allocation7 + $0x54] sm:$0xf]  ;;  %v2386_v2 = vor.u32 %v2995_v51, %v2383_v52  ;;  %v3761_v3 = vpack.c.bf16 %v375_v57, %v371_v56 }
  0x9d   : > { %953 = vmatpush.bf16.msra.mxu3 %v2406_v26  ;;  %v2247_v4 = vld [vmem:[#allocation7 + $0x58] sm:$0xf0]  ;;  %v2977_v5 = vld [vmem:[#allocation7 + $0xd4] sm:$0xf]  ;;  %v2450_v7 = vor.u32 %v3011_v59, %v2447_v60  ;;  %v2959_v14 = vld [vmem:[#allocation7 + $0x44] sm:$0xf] }
  0x9e   : > { %912 = vmatpush.bf16.msra.mxu0 %v2206_v33  ;;  %v2311_v6 = vld [vmem:[#allocation7 + $0xd8] sm:$0xf0]  ;;  %v2993_v8 = vld [vmem:[#allocation7 + $0x154] sm:$0xf]  ;;  %v2250_v12 = vor.u32 %v2961_v1, %v2247_v4  ;;  %v2239_v16 = vld [vmem:[#allocation7 + $0x48] sm:$0xf0] }
  0x9f   : > { %926 = vmatpush.bf16.msra.mxu1 %v2270_v37  ;;  %v2375_v9 = vld [vmem:[#allocation7 + $0x158] sm:$0xf0]  ;;  %v3009_v10 = vld [vmem:[#allocation7 + $0x1d4] sm:$0xf]  ;;  %v2314_v13 = vor.u32 %v2977_v5, %v2311_v6  ;;  %v2975_v17 = vld [vmem:[#allocation7 + $0xc4] sm:$0xf]  ;;  %v2242_v24 = vor.u32 %v2959_v14, %v2239_v16 }
  0xa0   : > { %940 = vmatpush.bf16.msra.mxu2 %v2334_v38  ;;  %v2439_v11 = vld [vmem:[#allocation7 + $0x1d8] sm:$0xf0]  ;;  %v2378_v15 = vor.u32 %v2993_v8, %v2375_v9  ;;  %v2303_v18 = vld [vmem:[#allocation7 + $0xc8] sm:$0xf0]  ;;  %v2991_v20 = vld [vmem:[#allocation7 + $0x144] sm:$0xf] }
  0xa1   : > { %954 = vmatpush.bf16.msra.mxu3 %v2398_v50  ;;  %913 = vmatmul.bf16.vlgmr.msra.gmra.mxu0 %v3757_v61  ;;  %v2442_v19 = vor.u32 %v3009_v10, %v2439_v11  ;;  %v2367_v21 = vld [vmem:[#allocation7 + $0x148] sm:$0xf0]  ;;  %v3007_v22 = vld [vmem:[#allocation7 + $0x1c4] sm:$0xf]  ;;  %v2306_v25 = vor.u32 %v2975_v17, %v2303_v18  ;;  %v2957_v26 = vld [vmem:[#allocation7 + $0x34] sm:$0xf] }
  0xa2   : > { %961 = vmatpush.bf16.msrb.mxu0 %v2266_v44  ;;  %927 = vmatmul.bf16.vlgmr.msra.gmra.mxu1 %v3759_v62  ;;  %v2431_v23 = vld [vmem:[#allocation7 + $0x1c8] sm:$0xf0]  ;;  %v2370_v27 = vor.u32 %v2991_v20, %v2367_v21  ;;  %v2231_v28 = vld [vmem:[#allocation7 + $0x38] sm:$0xf0]  ;;  %v2973_v29 = vld [vmem:[#allocation7 + $0xb4] sm:$0xf] }
  0xa3   : > { %975 = vmatpush.bf16.msrb.mxu1 %v2330_v45  ;;  %941 = vmatmul.bf16.vlgmr.msra.gmra.mxu2 %v3752_v55  ;;  %v2295_v30 = vld [vmem:[#allocation7 + $0xb8] sm:$0xf0]  ;;  %v2434_v31 = vor.u32 %v3007_v22, %v2431_v23  ;;  %v2989_v32 = vld [vmem:[#allocation7 + $0x134] sm:$0xf]  ;;  %v2234_v36 = vor.u32 %v2957_v26, %v2231_v28  ;;  %v2955_v38 = vld [vmem:[#allocation7 + $0x24] sm:$0xf] }
  0xa4   : > { %989 = vmatpush.bf16.msrb.mxu2 %v2394_v49  ;;  %955 = vmatmul.bf16.vlgmr.msra.gmra.mxu3 %v3761_v3  ;;  %v2359_v33 = vld [vmem:[#allocation7 + $0x138] sm:$0xf0]  ;;  %v3005_v34 = vld [vmem:[#allocation7 + $0x1b4] sm:$0xf]  ;;  %v2298_v37 = vor.u32 %v2973_v29, %v2295_v30  ;;  %v2223_v40 = vld [vmem:[#allocation7 + $0x28] sm:$0xf0] }
  0xa5   : > { %1003 = vmatpush.bf16.msrb.mxu3 %v2458_v54  ;;  %v2423_v35 = vld [vmem:[#allocation7 + $0x1b8] sm:$0xf0]  ;;  %v2362_v39 = vor.u32 %v2989_v32, %v2359_v33  ;;  %v2971_v41 = vld [vmem:[#allocation7 + $0xa4] sm:$0xf]  ;;  %v2287_v42 = vld [vmem:[#allocation7 + $0xa8] sm:$0xf0]  ;;  %v2226_v48 = vor.u32 %v2955_v38, %v2223_v40 }
  0xa6   : > { %962 = vmatpush.bf16.msrb.mxu0 %v2258_v63  ;;  %v2426_v43 = vor.u32 %v3005_v34, %v2423_v35  ;;  %v2987_v44 = vld [vmem:[#allocation7 + $0x124] sm:$0xf]  ;;  %v2351_v45 = vld [vmem:[#allocation7 + $0x128] sm:$0xf0]  ;;  %v2290_v49 = vor.u32 %v2971_v41, %v2287_v42  ;;  %v2953_v50 = vld [vmem:[#allocation7 + $0x14] sm:$0xf] }
  0xa7   : > { %976 = vmatpush.bf16.msrb.mxu1 %v2322_v0  ;;  %v3003_v46 = vld [vmem:[#allocation7 + $0x1a4] sm:$0xf]  ;;  %v2415_v47 = vld [vmem:[#allocation7 + $0x1a8] sm:$0xf0]  ;;  %v2354_v51 = vor.u32 %v2987_v44, %v2351_v45  ;;  %v2215_v52 = vld [vmem:[#allocation7 + $0x18] sm:$0xf0] }
  0xa8   : > { %990 = vmatpush.bf16.msrb.mxu2 %v2386_v2  ;;  %v2969_v53 = vld [vmem:[#allocation7 + $0x94] sm:$0xf]  ;;  %v2279_v54 = vld [vmem:[#allocation7 + $0x98] sm:$0xf0]  ;;  %v2418_v56 = vor.u32 %v3003_v46, %v2415_v47  ;;  %v2218_v63 = vor.u32 %v2953_v50, %v2215_v52  ;;  %v2951_v1 = vld [vmem:[#allocation7 + $0x4] sm:$0xf] }
  0xa9   : > { %1004 = vmatpush.bf16.msrb.mxu3 %v2450_v7  ;;  %v2985_v57 = vld [vmem:[#allocation7 + $0x114] sm:$0xf]  ;;  %v2343_v58 = vld [vmem:[#allocation7 + $0x118] sm:$0xf0]  ;;  %v2282_v0 = vor.u32 %v2969_v53, %v2279_v54  ;;  %v2207_v2 = vld [vmem:[#allocation7 + $0x8] sm:$0xf0] }
  0xaa   : > { %963 = vmatpush.bf16.msrb.mxu0 %v2250_v12  ;;  %v3001_v59 = vld [vmem:[#allocation7 + $0x194] sm:$0xf]  ;;  %v2407_v60 = vld [vmem:[#allocation7 + $0x198] sm:$0xf0]  ;;  %v2967_v4 = vld [vmem:[#allocation7 + $0x84] sm:$0xf]  ;;  %v2346_v5 = vor.u32 %v2985_v57, %v2343_v58  ;;  %v2210_v16 = vor.u32 %v2951_v1, %v2207_v2 }
  0xab   : > { %977 = vmatpush.bf16.msrb.mxu1 %v2314_v13  ;;  %v2271_v6 = vld [vmem:[#allocation7 + $0x88] sm:$0xf0]  ;;  %v2983_v7 = vld [vmem:[#allocation7 + $0x104] sm:$0xf]  ;;  %v2410_v9 = vor.u32 %v3001_v59, %v2407_v60  ;;  %v2469_v11 = vld [vmem:[#allocation7 + $0x210] sm:$0xf] }
  0xac   : > { %991 = vmatpush.bf16.msrb.mxu2 %v2378_v15  ;;  %v2335_v8 = vld [vmem:[#allocation7 + $0x108] sm:$0xf0]  ;;  %v2999_v10 = vld [vmem:[#allocation7 + $0x184] sm:$0xf]  ;;  %v3018_v12 = vld [vmem:[#allocation7 + $0x214] sm:$0xf0]  ;;  %v2274_v17 = vor.u32 %v2967_v4, %v2271_v6 }
  0xad   : > { %1005 = vmatpush.bf16.msrb.mxu3 %v2442_v19  ;;  %v2399_v13 = vld [vmem:[#allocation7 + $0x188] sm:$0xf0]  ;;  %v3017_v14 = vld [vmem:[#allocation7 + $0x214] sm:$0xf]  ;;  %v2471_v15 = vld [vmem:[#allocation7 + $0x218] sm:$0xf0]  ;;  %v2338_v18 = vor.u32 %v2983_v7, %v2335_v8  ;;  %v2470_v19 = vor.u32 %v3018_v12, %v2469_v11 }
  0xae   : > { %964 = vmatpush.bf16.msrb.mxu0 %v2242_v24  ;;  %v2402_v20 = vor.u32 %v2999_v10, %v2399_v13  ;;  %v2474_v21 = vor.u32 %v3017_v14, %v2471_v15  ;;  %v2461_v22 = vld [vmem:[#allocation7 + $0x200] sm:$0xf]  ;;  %v3016_v23 = vld [vmem:[#allocation7 + $0x204] sm:$0xf0]  ;;  %v3015_v24 = vld [vmem:[#allocation7 + $0x204] sm:$0xf] }
  0xaf   : > { %978 = vmatpush.bf16.msrb.mxu1 %v2306_v25  ;;  %v2463_v25 = vld [vmem:[#allocation7 + $0x208] sm:$0xf0]  ;;  %v2462_v26 = vor.u32 %v3016_v23, %v2461_v22  ;;  %v380_v28 = vld [vmem:[%s3733_s14] sm:$0xff]  ;;  %v3066_v32 = vld [vmem:[#allocation7 + $0x394] sm:$0xf0]  ;;  %s2931_s13 = sshll.u32 (%p3984_p6), %s3565_s22, 1 }
  0xb0   : > { %992 = vmatpush.bf16.msrb.mxu2 %v2370_v27  ;;  %v2466_v27 = vor.u32 %v3015_v24, %v2463_v25  ;;  %v381_v29 = vld [vmem:[%s3733_s14 + $0x8] sm:$0xff]  ;;  %v2599_v33 = vld [vmem:[#allocation7 + $0x410] sm:$0xf]  ;;  %v2591_v41 = vld [vmem:[#allocation7 + $0x400] sm:$0xf]  ;;  %s1987_s23 = ssub.s32 (%p3984_p6), 3, %s2931_s13 }
  0xb1   : > { %1006 = vmatpush.bf16.msrb.mxu3 %v2434_v31  ;;  %v382_v30 = vpack.c.bf16 %v381_v29, %v380_v28  ;;  %v2535_v31 = vld [vmem:[#allocation7 + $0x390] sm:$0xf]  ;;  %v3082_v35 = vld [vmem:[#allocation7 + $0x414] sm:$0xf0]  ;;  %v2601_v38 = vld [vmem:[#allocation7 + $0x418] sm:$0xf0] }
  0xb2   : > { %965 = vmatpush.bf16.msrb.mxu0 %v2234_v36  ;;  %v2536_v34 = vor.u32 %v3066_v32, %v2535_v31  ;;  %v2537_v36 = vld [vmem:[#allocation7 + $0x398] sm:$0xf0]  ;;  %v3064_v40 = vld [vmem:[#allocation7 + $0x384] sm:$0xf0]  ;;  %v3063_v44 = vld [vmem:[#allocation7 + $0x384] sm:$0xf] }
  0xb3   : > { %979 = vmatpush.bf16.msrb.mxu1 %v2298_v37  ;;  %v2529_v45 = vld [vmem:[#allocation7 + $0x388] sm:$0xf0]  ;;  %v3062_v52 = vld [vmem:[#allocation7 + $0x374] sm:$0xf0]  ;;  %v2583_v53 = vld [vmem:[#allocation7 + $0x3f0] sm:$0xf] }
  0xb4   : > { %993 = vmatpush.bf16.msrb.mxu2 %v2362_v39  ;;  %v2527_v39 = vld [vmem:[#allocation7 + $0x380] sm:$0xf]  ;;  %v2532_v47 = vor.u32 %v3063_v44, %v2529_v45  ;;  %v3061_v57 = vld [vmem:[#allocation7 + $0x374] sm:$0xf]  ;;  %v2521_v58 = vld [vmem:[#allocation7 + $0x378] sm:$0xf0] }
  0xb5   : > { %1007 = vmatpush.bf16.msrb.mxu3 %v2426_v43  ;;  %v2528_v42 = vor.u32 %v3064_v40, %v2527_v39  ;;  %v3080_v43 = vld [vmem:[#allocation7 + $0x404] sm:$0xf0]  ;;  %v2524_v60 = vor.u32 %v3061_v57, %v2521_v58  ;;  %v2511_v1 = vld [vmem:[#allocation7 + $0x360] sm:$0xf]  ;;  %v2513_v10 = vld [vmem:[#allocation7 + $0x368] sm:$0xf0] }
  0xb6   : > { %966 = vmatpush.bf16.msrb.mxu0 %v2226_v48  ;;  %v2592_v46 = vor.u32 %v3080_v43, %v2591_v41  ;;  %v3079_v48 = vld [vmem:[#allocation7 + $0x404] sm:$0xf]  ;;  %v3060_v4 = vld [vmem:[#allocation7 + $0x364] sm:$0xf0]  ;;  %v2577_v13 = vld [vmem:[#allocation7 + $0x3e8] sm:$0xf0] }
  0xb7   : > { %980 = vmatpush.bf16.msrb.mxu1 %v2290_v49  ;;  %v2593_v49 = vld [vmem:[#allocation7 + $0x408] sm:$0xf0]  ;;  %v3076_v6 = vld [vmem:[#allocation7 + $0x3e4] sm:$0xf0]  ;;  %v2512_v7 = vor.u32 %v3060_v4, %v2511_v1  ;;  %v3075_v11 = vld [vmem:[#allocation7 + $0x3e4] sm:$0xf] }
  0xb8   : > { %994 = vmatpush.bf16.msrb.mxu2 %v2354_v51  ;;  %v2596_v50 = vor.u32 %v3079_v48, %v2593_v49  ;;  %v2519_v51 = vld [vmem:[#allocation7 + $0x370] sm:$0xf]  ;;  %v2580_v14 = vor.u32 %v3075_v11, %v2577_v13  ;;  %v3073_v24 = vld [vmem:[#allocation7 + $0x3d4] sm:$0xf]  ;;  %v2569_v25 = vld [vmem:[#allocation7 + $0x3d8] sm:$0xf0] }
  0xb9   : > { %1008 = vmatpush.bf16.msrb.mxu3 %v2418_v56  ;;  %v2520_v54 = vor.u32 %v3062_v52, %v2519_v51  ;;  %v3078_v56 = vld [vmem:[#allocation7 + $0x3f4] sm:$0xf0]  ;;  %v2503_v15 = vld [vmem:[#allocation7 + $0x350] sm:$0xf]  ;;  %v3056_v28 = vld [vmem:[#allocation7 + $0x344] sm:$0xf0] }
  0xba   : > { %967 = vmatpush.bf16.msrb.mxu0 %v2218_v63  ;;  %v2584_v59 = vor.u32 %v3078_v56, %v2583_v53  ;;  %v3077_v63 = vld [vmem:[#allocation7 + $0x3f4] sm:$0xf]  ;;  %v2559_v29 = vld [vmem:[#allocation7 + $0x3c0] sm:$0xf]  ;;  %v3072_v31 = vld [vmem:[#allocation7 + $0x3c4] sm:$0xf0] }
  0xbb   : > { %981 = vmatpush.bf16.msrb.mxu1 %v2282_v0  ;;  %v2585_v0 = vld [vmem:[#allocation7 + $0x3f8] sm:$0xf0]  ;;  %v3055_v32 = vld [vmem:[#allocation7 + $0x344] sm:$0xf]  ;;  %v3070_v39 = vld [vmem:[#allocation7 + $0x3b4] sm:$0xf0] }
  0xbc   : > { %995 = vmatpush.bf16.msrb.mxu2 %v2346_v5  ;;  %v2588_v2 = vor.u32 %v3077_v63, %v2585_v0  ;;  %v2575_v5 = vld [vmem:[#allocation7 + $0x3e0] sm:$0xf]  ;;  %v3053_v40 = vld [vmem:[#allocation7 + $0x334] sm:$0xf]  ;;  %v2489_v41 = vld [vmem:[#allocation7 + $0x338] sm:$0xf0] }
  0xbd   : > { %1009 = vmatpush.bf16.msrb.mxu3 %v2410_v9  ;;  %v2576_v8 = vor.u32 %v3076_v6, %v2575_v5  ;;  %v3059_v9 = vld [vmem:[#allocation7 + $0x364] sm:$0xf]  ;;  %v2492_v43 = vor.u32 %v3053_v40, %v2489_v41  ;;  %v3069_v44 = vld [vmem:[#allocation7 + $0x3b4] sm:$0xf]  ;;  %v2553_v45 = vld [vmem:[#allocation7 + $0x3b8] sm:$0xf0] }
  0xbe   : > { %968 = vmatpush.bf16.msrb.mxu0 %v2210_v16  ;;  %v2516_v12 = vor.u32 %v3059_v9, %v2513_v10  ;;  %v3058_v16 = vld [vmem:[#allocation7 + $0x354] sm:$0xf0]  ;;  %v3052_v48 = vld [vmem:[#allocation7 + $0x324] sm:$0xf0]  ;;  %v2543_v49 = vld [vmem:[#allocation7 + $0x3a0] sm:$0xf] }
  0xbf   : > { %982 = vmatpush.bf16.msrb.mxu1 %v2274_v17  ;;  %v2567_v17 = vld [vmem:[#allocation7 + $0x3d0] sm:$0xf]  ;;  %v3068_v51 = vld [vmem:[#allocation7 + $0x3a4] sm:$0xf0]  ;;  %v3051_v52 = vld [vmem:[#allocation7 + $0x324] sm:$0xf] }
  0xc0   : > { %996 = vmatpush.bf16.msrb.mxu2 %v2338_v18  ;;  %v2504_v18 = vor.u32 %v3058_v16, %v2503_v15  ;;  %v2481_v53 = vld [vmem:[#allocation7 + $0x328] sm:$0xf0]  ;;  %v3067_v57 = vld [vmem:[#allocation7 + $0x3a4] sm:$0xf]  ;;  %v3034_v1 = vld [vmem:[#allocation7 + $0x294] sm:$0xf0] }
  0xc1   : > { %1010 = vmatpush.bf16.msrb.mxu3 %v2402_v20  ;;  %969 = vmatmul.bf16.vlgmr.msrb.gmra.mxu0 %v3757_v61  ;;  %v3065_v61 = vld [vmem:[#allocation7 + $0x394] sm:$0xf]  ;;  %v2484_v56 = vor.u32 %v3051_v52, %v2481_v53  ;;  %v2545_v58 = vld [vmem:[#allocation7 + $0x3a8] sm:$0xf0]  ;;  %v3050_v4 = vld [vmem:[#allocation7 + $0x314] sm:$0xf0] }
  0xc2   : > { %1054 = vmatpush.bf16.msra.mxu0 %v2470_v19  ;;  %983 = vmatmul.bf16.vlgmr.msrb.gmra.mxu1 %v3759_v62  ;;  %v2600_v62 = vor.u32 %v3082_v35, %v2599_v33  ;;  %v2540_v37 = vor.u32 %v3065_v61, %v2537_v36  ;;  %v3074_v19 = vld [vmem:[#allocation7 + $0x3d4] sm:$0xf0]  ;;  %v3057_v20 = vld [vmem:[#allocation7 + $0x354] sm:$0xf]  ;;  %v2497_v33 = vld [vmem:[#allocation7 + $0x348] sm:$0xf0]  ;;  %v2548_v0 = vor.u32 %v3067_v57, %v2545_v58 }
  0xc3   : > { %1068 = vmatpush.bf16.msra.mxu1 %v2474_v21  ;;  %997 = vmatmul.bf16.vlgmr.msrb.gmra.mxu2 %v3752_v55  ;;  %v3081_v55 = vld [vmem:[#allocation7 + $0x414] sm:$0xf]  ;;  %v2505_v21 = vld [vmem:[#allocation7 + $0x358] sm:$0xf0]  ;;  %v2568_v22 = vor.u32 %v3074_v19, %v2567_v17  ;;  %v2500_v35 = vor.u32 %v3055_v32, %v2497_v33  ;;  %v3071_v61 = vld [vmem:[#allocation7 + $0x3c4] sm:$0xf] }
  0xc4   : > { %1011 = vmatmul.bf16.vlgmr.msrb.gmra.mxu3 %v3761_v3  ;;  %1240 = vmatpush.bf16.msra.mxu2 %v2536_v34  ;;  %v2604_v3 = vor.u32 %v3081_v55, %v2601_v38  ;;  %v2508_v23 = vor.u32 %v3057_v20, %v2505_v21  ;;  %v2560_v34 = vor.u32 %v3072_v31, %v2559_v29  ;;  %v2561_v36 = vld [vmem:[#allocation7 + $0x3c8] sm:$0xf0]  ;;  %v3054_v55 = vld [vmem:[#allocation7 + $0x334] sm:$0xf0]  ;;  %v2551_v38 = vld [vmem:[#allocation7 + $0x3b0] sm:$0xf] }
  0xc5   : > { %1254 = vmatpush.bf16.msra.mxu3 %v2600_v62  ;;  %v2564_v62 = vor.u32 %v3071_v61, %v2561_v36  ;;  %v3049_v9 = vld [vmem:[#allocation7 + $0x314] sm:$0xf]  ;;  %v2729_v11 = vld [vmem:[#allocation7 + $0x318] sm:$0xf0]  ;;  %v2655_v13 = vld [vmem:[#allocation7 + $0x280] sm:$0xf] }
  0xc6   : > { %1055 = vmatpush.bf16.msra.mxu0 %v2462_v26  ;;  %v2572_v26 = vor.u32 %v3073_v24, %v2569_v25  ;;  %v2719_v16 = vld [vmem:[#allocation7 + $0x300] sm:$0xf]  ;;  %v3048_v17 = vld [vmem:[#allocation7 + $0x304] sm:$0xf0]  ;;  %v2657_v20 = vld [vmem:[#allocation7 + $0x288] sm:$0xf0] }
  0xc7   : > { %1069 = vmatpush.bf16.msra.mxu1 %v2466_v27  ;;  %v2495_v27 = vld [vmem:[#allocation7 + $0x340] sm:$0xf]  ;;  %v2720_v19 = vor.u32 %v3048_v17, %v2719_v16  ;;  %v3047_v21 = vld [vmem:[#allocation7 + $0x304] sm:$0xf]  ;;  %v2647_v25 = vld [vmem:[#allocation7 + $0x270] sm:$0xf] }
  0xc8   : > { %1241 = vmatpush.bf16.msra.mxu2 %v2528_v42  ;;  %v2552_v42 = vor.u32 %v3070_v39, %v2551_v38  ;;  %v3046_v29 = vld [vmem:[#allocation7 + $0x2f4] sm:$0xf0]  ;;  %v2649_v31 = vld [vmem:[#allocation7 + $0x278] sm:$0xf0]  ;;  %v2703_v38 = vld [vmem:[#allocation7 + $0x2e0] sm:$0xf] }
  0xc9   : > { %1255 = vmatpush.bf16.msra.mxu3 %v2592_v46  ;;  %v2556_v46 = vor.u32 %v3069_v44, %v2553_v45  ;;  %v3044_v39 = vld [vmem:[#allocation7 + $0x2e4] sm:$0xf0]  ;;  %v3027_v40 = vld [vmem:[#allocation7 + $0x264] sm:$0xf]  ;;  %v2641_v41 = vld [vmem:[#allocation7 + $0x268] sm:$0xf0] }
  0xca   : > { %1268 = vmatpush.bf16.msrb.mxu0 %v2540_v37  ;;  %v2487_v37 = vld [vmem:[#allocation7 + $0x330] sm:$0xf]  ;;  %v3043_v44 = vld [vmem:[#allocation7 + $0x2e4] sm:$0xf]  ;;  %v2705_v45 = vld [vmem:[#allocation7 + $0x2e8] sm:$0xf0] }
  0xcb   : > { %1282 = vmatpush.bf16.msrb.mxu1 %v2604_v3  ;;  %v2488_v3 = vor.u32 %v3054_v55, %v2487_v37  ;;  %v2639_v37 = vld [vmem:[#allocation7 + $0x260] sm:$0xf]  ;;  %v3028_v55 = vld [vmem:[#allocation7 + $0x264] sm:$0xf0]  ;;  %v3025_v52 = vld [vmem:[#allocation7 + $0x254] sm:$0xf] }
  0xcc   : > { %1242 = vmatpush.bf16.msra.mxu2 %v2520_v54  ;;  %v2544_v54 = vor.u32 %v3068_v51, %v2543_v49  ;;  %v2695_v49 = vld [vmem:[#allocation7 + $0x2d0] sm:$0xf]  ;;  %v3042_v51 = vld [vmem:[#allocation7 + $0x2d4] sm:$0xf0]  ;;  %v2633_v53 = vld [vmem:[#allocation7 + $0x258] sm:$0xf0] }
  0xcd   : > { %1256 = vmatpush.bf16.msra.mxu3 %v2584_v59  ;;  %v2663_v59 = vld [vmem:[#allocation7 + $0x290] sm:$0xf]  ;;  %v3041_v57 = vld [vmem:[#allocation7 + $0x2d4] sm:$0xf]  ;;  %v2697_v58 = vld [vmem:[#allocation7 + $0x2d8] sm:$0xf0] }
  0xce   : > { %1269 = vmatpush.bf16.msrb.mxu0 %v2532_v47  ;;  %v2479_v47 = vld [vmem:[#allocation7 + $0x320] sm:$0xf]  ;;  %v2664_v5 = vor.u32 %v3034_v1, %v2663_v59  ;;  %v3024_v1 = vld [vmem:[#allocation7 + $0x244] sm:$0xf0]  ;;  %v2679_v16 = vld [vmem:[#allocation7 + $0x2b0] sm:$0xf] }
  0xcf   : > { %1283 = vmatpush.bf16.msrb.mxu1 %v2596_v50  ;;  %v2480_v50 = vor.u32 %v3052_v48, %v2479_v47  ;;  %v2631_v47 = vld [vmem:[#allocation7 + $0x250] sm:$0xf]  ;;  %v3026_v48 = vld [vmem:[#allocation7 + $0x254] sm:$0xf0]  ;;  %v2623_v59 = vld [vmem:[#allocation7 + $0x240] sm:$0xf] }
  0xd0   : > { %1243 = vmatpush.bf16.msra.mxu2 %v2512_v7  ;;  %v3033_v7 = vld [vmem:[#allocation7 + $0x294] sm:$0xf]  ;;  %v3038_v17 = vld [vmem:[#allocation7 + $0x2b4] sm:$0xf0]  ;;  %p1988_p7 = scmp.lt.s32.totalorder (%p3984_p6), %s1987_s23, 2 }
  0xd1   : > { %2475 = vmatmul.msk.bf16.vlgmr.msra.gmra.mxu0 %vm1044_vm0, %v382_v30  ;;  %1257 = vmatpush.bf16.msra.mxu3 %v2576_v8  ;;  %v2665_v8 = vld [vmem:[#allocation7 + $0x298] sm:$0xf0] }
  0xd2   : > { %2476 = vmatmul.msk.bf16.vlgmr.msra.gmra.mxu1 %vm1044_vm0, %v382_v30  ;;  %1270 = vmatpush.bf16.msrb.mxu0 %v2524_v60  ;;  %v2496_v30 = vor.u32 %v3056_v28, %v2495_v27  ;;  %v2668_v10 = vor.u32 %v3033_v7, %v2665_v8  ;;  %v2711_v27 = vld [vmem:[#allocation7 + $0x2f0] sm:$0xf]  ;;  %v3023_v7 = vld [vmem:[#allocation7 + $0x244] sm:$0xf]  ;;  %v2625_v8 = vld [vmem:[#allocation7 + $0x248] sm:$0xf0] }
  0xd3   : > { %1284 = vmatpush.bf16.msrb.mxu1 %v2588_v2  ;;  %v2727_v2 = vld [vmem:[#allocation7 + $0x310] sm:$0xf]  ;;  %v2712_v32 = vor.u32 %v3046_v29, %v2711_v27  ;;  %v2671_v29 = vld [vmem:[#allocation7 + $0x2a0] sm:$0xf] }
  0xd4   : > { %1244 = vmatpush.bf16.msra.mxu2 %v2504_v18  ;;  %v2728_v6 = vor.u32 %v3050_v4, %v2727_v2  ;;  %v3031_v18 = vld [vmem:[#allocation7 + $0x284] sm:$0xf]  ;;  %v2687_v2 = vld [vmem:[#allocation7 + $0x2c0] sm:$0xf]  ;;  %v3040_v4 = vld [vmem:[#allocation7 + $0x2c4] sm:$0xf0] }
  0xd5   : > { %1258 = vmatpush.bf16.msra.mxu3 %v2568_v22  ;;  %v2721_v22 = vld [vmem:[#allocation7 + $0x308] sm:$0xf0] }
  0xd6   : > { %1271 = vmatpush.bf16.msrb.mxu0 %v2516_v12  ;;  %v2732_v12 = vor.u32 %v3049_v9, %v2729_v11  ;;  %v2724_v24 = vor.u32 %v3047_v21, %v2721_v22  ;;  %v3039_v9 = vld [vmem:[#allocation7 + $0x2c4] sm:$0xf]  ;;  %v2688_v11 = vor.u32 %v3040_v4, %v2687_v2  ;;  %v3037_v22 = vld [vmem:[#allocation7 + $0x2b4] sm:$0xf] }
  0xd7   : > { %1285 = vmatpush.bf16.msrb.mxu1 %v2580_v14  ;;  %v3032_v14 = vld [vmem:[#allocation7 + $0x284] sm:$0xf0] }
  0xd8   : > { %1245 = vmatpush.bf16.msra.mxu2 %v2496_v30  ;;  %v2656_v15 = vor.u32 %v3032_v14, %v2655_v13  ;;  %v3029_v30 = vld [vmem:[#allocation7 + $0x274] sm:$0xf]  ;;  %v2615_v13 = vld [vmem:[#allocation7 + $0x230] sm:$0xf]  ;;  %v2628_v14 = vor.u32 %v3023_v7, %v2625_v8 }
  0xd9   : > { %1259 = vmatpush.bf16.msra.mxu3 %v2560_v34  ;;  %v2652_v33 = vor.u32 %v3029_v30, %v2649_v31  ;;  %v3045_v34 = vld [vmem:[#allocation7 + $0x2f4] sm:$0xf]  ;;  %v3036_v30 = vld [vmem:[#allocation7 + $0x2a4] sm:$0xf0] }
  0xda   : > { %1272 = vmatpush.bf16.msrb.mxu0 %v2508_v23  ;;  %v2660_v23 = vor.u32 %v3031_v18, %v2657_v20  ;;  %v2617_v20 = vld [vmem:[#allocation7 + $0x238] sm:$0xf0] }
  0xdb   : > { %1286 = vmatpush.bf16.msrb.mxu1 %v2572_v26  ;;  %v3030_v26 = vld [vmem:[#allocation7 + $0x274] sm:$0xf0] }
  0xdc   : > { %1246 = vmatpush.bf16.msra.mxu2 %v2488_v3  ;;  %v2648_v28 = vor.u32 %v3030_v26, %v2647_v25  ;;  %v2640_v3 = vor.u32 %v3028_v55, %v2639_v37  ;;  %v2680_v25 = vor.u32 %v3038_v17, %v2679_v16  ;;  %v2607_v26 = vld [vmem:[#allocation7 + $0x220] sm:$0xf]  ;;  %v3035_v37 = vld [vmem:[#allocation7 + $0x2a4] sm:$0xf]  ;;  %v2673_v55 = vld [vmem:[#allocation7 + $0x2a8] sm:$0xf0] }
  0xdd   : > { %1260 = vmatpush.bf16.msra.mxu3 %v2552_v42  ;;  %v2704_v42 = vor.u32 %v3044_v39, %v2703_v38 }
  0xde   : > { %1273 = vmatpush.bf16.msrb.mxu0 %v2500_v35  ;;  %v2713_v35 = vld [vmem:[#allocation7 + $0x2f8] sm:$0xf0] }
  0xdf   : > { %1287 = vmatpush.bf16.msrb.mxu1 %v2564_v62  ;;  %v2716_v61 = vor.u32 %v3045_v34, %v2713_v35  ;;  %v2609_v34 = vld [vmem:[#allocation7 + $0x228] sm:$0xf0] }
  0xe0   : > { %1247 = vmatpush.bf16.msra.mxu2 %v2480_v50  ;;  %v2632_v50 = vor.u32 %v3026_v48, %v2631_v47 }
  0xe1   : > { %1261 = vmatpush.bf16.msra.mxu3 %v2544_v54  ;;  %v2696_v54 = vor.u32 %v3042_v51, %v2695_v49 }
  0xe2   : > { %1274 = vmatpush.bf16.msrb.mxu0 %v2492_v43  ;;  %v2644_v43 = vor.u32 %v3027_v40, %v2641_v41  ;;  %v2676_v40 = vor.u32 %v3035_v37, %v2673_v55  ;;  %v2839_v37 = vld [vmem:[#allocation7 + $0x4f0] sm:$0xf]  ;;  %v3110_v55 = vld [vmem:[#allocation7 + $0x4f4] sm:$0xf0] }
  0xe3   : > { %1288 = vmatpush.bf16.msrb.mxu1 %v2556_v46  ;;  %v2708_v46 = vor.u32 %v3043_v44, %v2705_v45  ;;  %v1018_v45 = vld [vmem:[#allocation8 + $0x1] ss:$8 sm:$0x3] }
  0xe4   : > { %1456 = vmatpush.bf16.msrb.mxu2 %v2664_v5  ;;  %v1020_v47 = vperm.slane %v1018_v45, 0  ;;  %v1021_v48 = vperm.slane %v1018_v45, 1  ;;  %v2785_v45 = vld [vmem:[#allocation7 + $0x488] sm:$0xf0] }
  0xe5   : > { %1470 = vmatpush.bf16.msrb.mxu3 %v2728_v6 }
  0xe6   : > { %1275 = vmatpush.bf16.msrb.mxu0 %v2484_v56  ;;  %v2636_v56 = vor.u32 %v3025_v52, %v2633_v53 }
  0xe7   : > { %1289 = vmatpush.bf16.msrb.mxu1 %v2548_v0  ;;  %v2700_v0 = vor.u32 %v3041_v57, %v2697_v58 }
  0xe8   : > { %1457 = vmatpush.bf16.msrb.mxu2 %v2656_v15  ;;  %v3022_v15 = vld [vmem:[#allocation7 + $0x234] sm:$0xf0] }
  0xe9   : > { %1471 = vmatpush.bf16.msrb.mxu3 %v2720_v19  ;;  %v3021_v19 = vld [vmem:[#allocation7 + $0x234] sm:$0xf] }
  0xea   : > { %1484 = vmatpush.bf16.msra.mxu0 %v2668_v10  ;;  %v2624_v10 = vor.u32 %v3024_v1, %v2623_v59  ;;  %v2620_v27 = vor.u32 %v3021_v19, %v2617_v20  ;;  %v3114_v20 = vld [vmem:[#allocation7 + $0x514] sm:$0xf0] }
  0xeb   : > { %1498 = vmatpush.bf16.msra.mxu1 %v2732_v12  ;;  %v2689_v12 = vld [vmem:[#allocation7 + $0x2c8] sm:$0xf0] }
  0xec   : > { %1458 = vmatpush.bf16.msrb.mxu2 %v2648_v28  ;;  %v2692_v18 = vor.u32 %v3039_v9, %v2689_v12  ;;  %v3020_v28 = vld [vmem:[#allocation7 + $0x224] sm:$0xf0] }
  0xed   : > { %1472 = vmatpush.bf16.msrb.mxu3 %v2712_v32  ;;  %v2608_v38 = vor.u32 %v3020_v28, %v2607_v26  ;;  %v3112_v26 = vld [vmem:[#allocation7 + $0x504] sm:$0xf0] }
  0xee   : > { %1485 = vmatpush.bf16.msra.mxu0 %v2660_v23  ;;  %v2681_v23 = vld [vmem:[#allocation7 + $0x2b8] sm:$0xf0] }
  0xef   : > { %1499 = vmatpush.bf16.msra.mxu1 %v2724_v24  ;;  %v2616_v24 = vor.u32 %v3022_v15, %v2615_v13  ;;  %v2684_v32 = vor.u32 %v3037_v22, %v2681_v23  ;;  %v2857_v23 = vld [vmem:[#allocation7 + $0x518] sm:$0xf0] }
  0xf0   : > { %1459 = vmatpush.bf16.msrb.mxu2 %v2640_v3  ;;  %v2672_v3 = vor.u32 %v3036_v30, %v2671_v29  ;;  %v2849_v29 = vld [vmem:[#allocation7 + $0x508] sm:$0xf0] }
  0xf1   : > { %1473 = vmatpush.bf16.msrb.mxu3 %v2704_v42 }
  0xf2   : > { %1486 = vmatpush.bf16.msra.mxu0 %v2652_v33  ;;  %v3019_v33 = vld [vmem:[#allocation7 + $0x224] sm:$0xf] }
  0xf3   : > { %1500 = vmatpush.bf16.msra.mxu1 %v2716_v61  ;;  %v2612_v39 = vor.u32 %v3019_v33, %v2609_v34  ;;  %v3097_v33 = vld [vmem:[#allocation7 + $0x494] sm:$0xf] }
  0xf4   : > { %1460 = vmatpush.bf16.msrb.mxu2 %v2632_v50 }
  0xf5   : > { %1474 = vmatpush.bf16.msrb.mxu3 %v2696_v54 }
  0xf6   : > { %1487 = vmatpush.bf16.msra.mxu0 %v2644_v43 }
  0xf7   : > { %1501 = vmatpush.bf16.msra.mxu1 %v2708_v46  ;;  %v579_v46 = vld [vmem:[#allocation8] ss:$8 sm:$0x3] }
  0xf8   : > { %1461 = vmatpush.bf16.msrb.mxu2 %v2624_v10  ;;  %v581_v50 = vperm.slane %v579_v46, 0  ;;  %v582_v58 = vperm.slane %v579_v46, 1 }
  0xf9   : > { %1475 = vmatpush.bf16.msrb.mxu3 %v2688_v11 }
  0xfa   : > { %1488 = vmatpush.bf16.msra.mxu0 %v2636_v56 }
  0xfb   : > { %1502 = vmatpush.bf16.msra.mxu1 %v2700_v0 }
  0xfc   : > { %1462 = vmatpush.bf16.msrb.mxu2 %v2616_v24 }
  0xfd   : > { %1476 = vmatpush.bf16.msrb.mxu3 %v2680_v25  ;;  %v2847_v25 = vld [vmem:[#allocation7 + $0x500] sm:$0xf] }
  0xfe   : > { %1489 = vmatpush.bf16.msra.mxu0 %v2628_v14  ;;  %v2848_v28 = vor.u32 %v3112_v26, %v2847_v25  ;;  %v3089_v25 = vld [vmem:[#allocation7 + $0x454] sm:$0xf] }
  0xff   : > { %1503 = vmatpush.bf16.msra.mxu1 %v2692_v18 }
 0x100   : > { %1463 = vmatpush.bf16.msrb.mxu2 %v2608_v38  ;;  %v3109_v38 = vld [vmem:[#allocation7 + $0x4f4] sm:$0xf] }
 0x101   : > { %1477 = vmatpush.bf16.msrb.mxu3 %v2672_v3  ;;  %v2840_v3 = vor.u32 %v3110_v55, %v2839_v37  ;;  %v3087_v37 = vld [vmem:[#allocation7 + $0x444] sm:$0xf] }
 0x102   : > { %1490 = vmatpush.bf16.msra.mxu0 %v2620_v27  ;;  %v3111_v27 = vld [vmem:[#allocation7 + $0x504] sm:$0xf] }
 0x103   : > { %1504 = vmatpush.bf16.msra.mxu1 %v2684_v32  ;;  %v2852_v30 = vor.u32 %v3111_v27, %v2849_v29  ;;  %v3098_v32 = vld [vmem:[#allocation7 + $0x494] sm:$0xf0]  ;;  %v2761_v27 = vld [vmem:[#allocation7 + $0x458] sm:$0xf0]  ;;  %v2807_v29 = vld [vmem:[#allocation7 + $0x4b0] sm:$0xf] }
 0x106   : > { %1491 = vmatpush.bf16.msra.mxu0 %v2612_v39  ;;  %v2841_v39 = vld [vmem:[#allocation7 + $0x4f8] sm:$0xf0] }
 0x107   : > { %1505 = vmatpush.bf16.msra.mxu1 %v2676_v40  ;;  %v2844_v40 = vor.u32 %v3109_v38, %v2841_v39  ;;  %v2753_v38 = vld [vmem:[#allocation7 + $0x448] sm:$0xf0]  ;;  %v2799_v39 = vld [vmem:[#allocation7 + $0x4a0] sm:$0xf] }
 0x11e   : > { %v3773_v60 = vpop.f32.mrf.mxu0 }
 0x11f   : > { %v3775_v63 = vpop.f32.mrf.mxu1  ;;  %v915_v0 = vadd.f32 %v3773_v60, %v581_v50 }
 0x121   : > { %v929_v8 = vadd.f32 %v3775_v63, %v915_v0  ;;  %v3093_v0 = vld [vmem:[#allocation7 + $0x474] sm:$0xf] }
 0x126   : > { %v3777_v36 = vpop.f32.mrf.mxu0  ;;  %v3785_v21 = vpop.f32.mrf.mxu2 }
 0x127   : > { %v3779_v62 = vpop.f32.mrf.mxu1  ;;  %v956_v31 = vpop.f32.mrf.mxu3  ;;  %v917_v1 = vadd.f32 %v3777_v36, %v581_v50  ;;  %v943_v36 = vadd.f32 %v3785_v21, %v929_v8  ;;  %v3113_v21 = vld [vmem:[#allocation7 + $0x514] sm:$0xf]  ;;  %v3106_v8 = vld [vmem:[#allocation7 + $0x4d4] sm:$0xf0] }
 0x128   : > { %v2860_v24 = vor.u32 %v3113_v21, %v2857_v23  ;;  %v2817_v21 = vld [vmem:[#allocation7 + $0x4c8] sm:$0xf0]  ;;  %v2759_v23 = vld [vmem:[#allocation7 + $0x450] sm:$0xf] }
 0x129   : > { %v931_v9 = vadd.f32 %v3779_v62, %v917_v1  ;;  %v3806_v17 = vadd.f32 %v956_v31, %v943_v36  ;;  %v2791_v31 = vld [vmem:[#allocation7 + $0x490] sm:$0xf]  ;;  %v2767_v36 = vld [vmem:[#allocation7 + $0x460] sm:$0xf] }
 0x12a   : > { %v2792_v34 = vor.u32 %v3098_v32, %v2791_v31  ;;  %v3101_v31 = vld [vmem:[#allocation7 + $0x4b4] sm:$0xf] }
 0x12e   : > { %v944_v41 = vpop.f32.mrf.mxu2 }
 0x12f   : > { %v958_v44 = vpop.f32.mrf.mxu3  ;;  %v945_v12 = vadd.f32 %v944_v41, %v931_v9  ;;  %v2783_v41 = vld [vmem:[#allocation7 + $0x480] sm:$0xf]  ;;  %v3105_v9 = vld [vmem:[#allocation7 + $0x4d4] sm:$0xf] }
 0x131   : > { %v3808_v18 = vadd.f32 %v958_v44, %v945_v12  ;;  %v3092_v12 = vld [vmem:[#allocation7 + $0x464] sm:$0xf0] }
 0x133   : > { %v1076_v62 = vpack.c.bf16 %v3808_v18, %v3806_v17 }
 0x13e   : > { %v3781_v5 = vpop.f32.mrf.mxu0 }
 0x13f   : > { %v3783_v6 = vpop.f32.mrf.mxu1  ;;  %v971_v10 = vadd.f32 %v3781_v5, %v582_v58 }
 0x141   : > { %v985_v13 = vadd.f32 %v3783_v6, %v971_v10  ;;  %v2855_v6 = vld [vmem:[#allocation7 + $0x510] sm:$0xf] }
 0x142   : > { %v2856_v22 = vor.u32 %v3114_v20, %v2855_v6  ;;  %v3103_v6 = vld [vmem:[#allocation7 + $0x4c4] sm:$0xf] }
 0x146   : > { %v972_v35 = vpop.f32.mrf.mxu0  ;;  %v998_v49 = vpop.f32.mrf.mxu2 }
 0x147   : > { %v986_v61 = vpop.f32.mrf.mxu1  ;;  %v1012_v59 = vpop.f32.mrf.mxu3  ;;  %v973_v7 = vadd.f32 %v972_v35, %v582_v58  ;;  %v999_v16 = vadd.f32 %v998_v49, %v985_v13  ;;  %v2793_v35 = vld [vmem:[#allocation7 + $0x498] sm:$0xf0]  ;;  %v3107_v49 = vld [vmem:[#allocation7 + $0x4e4] sm:$0xf]  ;;  %v2775_v58 = vld [vmem:[#allocation7 + $0x470] sm:$0xf]  ;;  %v2768_v13 = vor.u32 %v3092_v12, %v2767_v36 }
 0x149   : > { %v987_v11 = vadd.f32 %v986_v61, %v973_v7  ;;  %v3812_v63 = vadd.f32 %v1012_v59, %v999_v16  ;;  %v2796_v61 = vor.u32 %v3097_v33, %v2793_v35  ;;  %v3094_v59 = vld [vmem:[#allocation7 + $0x474] sm:$0xf0]  ;;  %v2823_v7 = vld [vmem:[#allocation7 + $0x4d0] sm:$0xf]  ;;  %v2809_v33 = vld [vmem:[#allocation7 + $0x4b8] sm:$0xf0] }
 0x14a   : > { %v2776_v1 = vor.u32 %v3094_v59, %v2775_v58  ;;  %v2824_v10 = vor.u32 %v3106_v8, %v2823_v7  ;;  %v2751_v35 = vld [vmem:[#allocation7 + $0x440] sm:$0xf]  ;;  %v3084_v59 = vld [vmem:[#allocation7 + $0x424] sm:$0xf0] }
 0x14b   : > { %v2735_v58 = vld [vmem:[#allocation7 + $0x420] sm:$0xf] }
 0x14e   : > { %v1057_v42 = vpop.f32.mrf.mxu0  ;;  %v1000_v60 = vpop.f32.mrf.mxu2 }
 0x14f   : > { %v1071_v43 = vpop.f32.mrf.mxu1  ;;  %v3787_v53 = vadd.f32 %v1057_v42, %v1020_v47  ;;  %v1001_v14 = vadd.f32 %v1000_v60, %v987_v11  ;;  %v1014_v15 = vpop.f32.mrf.mxu3  ;;  %v3096_v42 = vld [vmem:[#allocation7 + $0x484] sm:$0xf0]  ;;  %v2825_v60 = vld [vmem:[#allocation7 + $0x4d8] sm:$0xf0] }
 0x150   : > { %v3789_v54 = vadd.f32 %v1071_v43, %v1021_v48  ;;  %v3095_v43 = vld [vmem:[#allocation7 + $0x484] sm:$0xf]  ;;  %v2784_v44 = vor.u32 %v3096_v42, %v2783_v41  ;;  %v2828_v11 = vor.u32 %v3105_v9, %v2825_v60 }
 0x151   : > { %v3810_v19 = vadd.f32 %v1014_v15, %v1001_v14  ;;  %v2788_v46 = vor.u32 %v3095_v43, %v2785_v45  ;;  %v3091_v14 = vld [vmem:[#allocation7 + $0x464] sm:$0xf]  ;;  %v2769_v15 = vld [vmem:[#allocation7 + $0x468] sm:$0xf0]  ;;  %v2743_v45 = vld [vmem:[#allocation7 + $0x430] sm:$0xf] }
 0x152   : > { %v2772_v16 = vor.u32 %v3091_v14, %v2769_v15  ;;  %v3099_v41 = vld [vmem:[#allocation7 + $0x4a4] sm:$0xf]  ;;  %v2801_v43 = vld [vmem:[#allocation7 + $0x4a8] sm:$0xf0] }
 0x153   : > { %v1077_v5 = vpack.c.bf16 %v3810_v19, %v3812_v63  ;;  %v1513_v15 = vld [vmem:[#allocation8 + $0x2] ss:$8 sm:$0x3] }
 0x156   : > { %v1059_v51 = vpop.f32.mrf.mxu0 }
 0x157   : > { %v1073_v52 = vpop.f32.mrf.mxu1  ;;  %v3791_v56 = vadd.f32 %v1059_v51, %v1020_v47  ;;  %v2831_v47 = vld [vmem:[#allocation7 + $0x4e0] sm:$0xf]  ;;  %v2833_v51 = vld [vmem:[#allocation7 + $0x4e8] sm:$0xf0] }
 0x158   : > { %v3793_v57 = vadd.f32 %v1073_v52, %v1021_v48  ;;  %v3108_v48 = vld [vmem:[#allocation7 + $0x4e4] sm:$0xf0]  ;;  %v2836_v52 = vor.u32 %v3107_v49, %v2833_v51  ;;  %v2745_v51 = vld [vmem:[#allocation7 + $0x438] sm:$0xf0] }
 0x159   : > { %v1078_v2 = vpack.c.bf16 %v3791_v56, %v3787_v53  ;;  %v2832_v50 = vor.u32 %v3108_v48, %v2831_v47  ;;  %v3085_v47 = vld [vmem:[#allocation7 + $0x434] sm:$0xf] }
 0x15a   : > { %v1079_v4 = vpack.c.bf16 %v3793_v57, %v3789_v54 }
 0x15b   : > { %1248 = vmatmul.bf16.vlgmr.msra.gmra.mxu2 %v1078_v2  ;;  %1276 = vmatmul.bf16.vlgmr.msrb.gmra.mxu0 %v1078_v2  ;;  %v2777_v2 = vld [vmem:[#allocation7 + $0x478] sm:$0xf0] }
 0x15c   : > { %1262 = vmatmul.bf16.vlgmr.msra.gmra.mxu3 %v1079_v4  ;;  %1290 = vmatmul.bf16.vlgmr.msrb.gmra.mxu1 %v1079_v4  ;;  %v2780_v4 = vor.u32 %v3093_v0, %v2777_v2  ;;  %v3083_v0 = vld [vmem:[#allocation7 + $0x424] sm:$0xf]  ;;  %v2737_v2 = vld [vmem:[#allocation7 + $0x428] sm:$0xf0] }
 0x15d   : > { %1710 = vmatpush.bf16.msra.mxu3 %v2856_v22  ;;  %1738 = vmatpush.bf16.msrb.mxu1 %v2860_v24  ;;  %v2820_v22 = vor.u32 %v3103_v6, %v2817_v21  ;;  %v3090_v24 = vld [vmem:[#allocation7 + $0x454] sm:$0xf0]  ;;  %v2740_v8 = vor.u32 %v3083_v0, %v2737_v2  ;;  %v1516_v21 = vperm.slane %v1513_v15, 1  ;;  %v3121_v0 = vld [vmem:[#allocation7 + $0x584] sm:$0xf0] }
 0x15e   : > { %1696 = vmatpush.bf16.msra.mxu2 %v2792_v34  ;;  %1724 = vmatpush.bf16.msrb.mxu0 %v2796_v61  ;;  %v2760_v26 = vor.u32 %v3090_v24, %v2759_v23  ;;  %v2812_v34 = vor.u32 %v3101_v31, %v2809_v33  ;;  %v3088_v61 = vld [vmem:[#allocation7 + $0x444] sm:$0xf0] }
 0x15f   : > { %v2752_v55 = vor.u32 %v3088_v61, %v2751_v35 }
 0x161   : > { %1711 = vmatpush.bf16.msra.mxu3 %v2848_v28  ;;  %1739 = vmatpush.bf16.msrb.mxu1 %v2852_v30  ;;  %v2764_v28 = vor.u32 %v3089_v25, %v2761_v27  ;;  %v3102_v30 = vld [vmem:[#allocation7 + $0x4b4] sm:$0xf0] }
 0x162   : > { %1697 = vmatpush.bf16.msra.mxu2 %v2784_v44  ;;  %1725 = vmatpush.bf16.msrb.mxu0 %v2788_v46  ;;  %v2808_v32 = vor.u32 %v3102_v30, %v2807_v29  ;;  %v2804_v44 = vor.u32 %v3099_v41, %v2801_v43  ;;  %v3086_v46 = vld [vmem:[#allocation7 + $0x434] sm:$0xf0]  ;;  %v1515_v30 = vperm.slane %v1513_v15, 0 }
 0x163   : > { %v3130_v43 = vld [vmem:[#allocation7 + $0x614] sm:$0xf0] }
 0x165   : > { %1712 = vmatpush.bf16.msra.mxu3 %v2840_v3  ;;  %1740 = vmatpush.bf16.msrb.mxu1 %v2844_v40  ;;  %v2756_v3 = vor.u32 %v3087_v37, %v2753_v38  ;;  %v3100_v40 = vld [vmem:[#allocation7 + $0x4a4] sm:$0xf0] }
 0x166   : > { %1698 = vmatpush.bf16.msra.mxu2 %v2776_v1  ;;  %1726 = vmatpush.bf16.msrb.mxu0 %v2780_v4  ;;  %v2800_v42 = vor.u32 %v3100_v40, %v2799_v39  ;;  %v2736_v1 = vor.u32 %v3084_v59, %v2735_v58  ;;  %v2891_v59 = vld [vmem:[#allocation7 + $0x580] sm:$0xf] }
 0x167   : > { %v2892_v2 = vor.u32 %v3121_v0, %v2891_v59  ;;  %v3115_v59 = vld [vmem:[#allocation7 + $0x524] sm:$0xf0] }
 0x169   : > { %1713 = vmatpush.bf16.msra.mxu3 %v2832_v50  ;;  %1741 = vmatpush.bf16.msrb.mxu1 %v2836_v52  ;;  %v2744_v50 = vor.u32 %v3086_v46, %v2743_v45  ;;  %v2748_v52 = vor.u32 %v3085_v47, %v2745_v51  ;;  %v2923_v45 = vld [vmem:[#allocation7 + $0x600] sm:$0xf]  ;;  %v3129_v46 = vld [vmem:[#allocation7 + $0x604] sm:$0xf0]  ;;  %v2919_v51 = vld [vmem:[#allocation7 + $0x5f0] sm:$0xf] }
 0x16a   : > { %1699 = vmatpush.bf16.msra.mxu2 %v2768_v13  ;;  %1727 = vmatpush.bf16.msrb.mxu0 %v2772_v16  ;;  %v2924_v47 = vor.u32 %v3129_v46, %v2923_v45 }
 0x16b   : > { %1464 = vmatmul.bf16.vlgmr.msrb.gmra.mxu2 %v1076_v62  ;;  %1492 = vmatmul.bf16.vlgmr.msra.gmra.mxu0 %v1076_v62  ;;  %v2815_v62 = vld [vmem:[#allocation7 + $0x4c0] sm:$0xf] }
 0x16c   : > { %1478 = vmatmul.bf16.vlgmr.msrb.gmra.mxu3 %v1077_v5  ;;  %1506 = vmatmul.bf16.vlgmr.msra.gmra.mxu1 %v1077_v5  ;;  %v3104_v5 = vld [vmem:[#allocation7 + $0x4c4] sm:$0xf0] }
 0x16d   : > { %1714 = vmatpush.bf16.msra.mxu3 %v2824_v10  ;;  %1742 = vmatpush.bf16.msrb.mxu1 %v2828_v11  ;;  %v2816_v20 = vor.u32 %v3104_v5, %v2815_v62 }
 0x16e   : > { %1700 = vmatpush.bf16.msra.mxu2 %v2760_v26  ;;  %1728 = vmatpush.bf16.msrb.mxu0 %v2764_v28 }
 0x171   : > { %1715 = vmatpush.bf16.msra.mxu3 %v2816_v20  ;;  %1743 = vmatpush.bf16.msrb.mxu1 %v2820_v22 }
 0x172   : > { %1701 = vmatpush.bf16.msra.mxu2 %v2752_v55  ;;  %1729 = vmatpush.bf16.msrb.mxu0 %v2756_v3 }
 0x175   : > { %1716 = vmatpush.bf16.msra.mxu3 %v2808_v32  ;;  %1744 = vmatpush.bf16.msrb.mxu1 %v2812_v34 }
 0x176   : > { %1702 = vmatpush.bf16.msra.mxu2 %v2744_v50  ;;  %1730 = vmatpush.bf16.msrb.mxu0 %v2748_v52  ;;  %v3128_v52 = vld [vmem:[#allocation7 + $0x5f4] sm:$0xf0] }
 0x177   : > { %v2920_v58 = vor.u32 %v3128_v52, %v2919_v51 }
 0x179   : > { %1717 = vmatpush.bf16.msra.mxu3 %v2800_v42  ;;  %1745 = vmatpush.bf16.msrb.mxu1 %v2804_v44  ;;  %v2927_v42 = vld [vmem:[#allocation7 + $0x610] sm:$0xf] }
 0x17a   : > { %1703 = vmatpush.bf16.msra.mxu2 %v2736_v1  ;;  %1731 = vmatpush.bf16.msrb.mxu0 %v2740_v8  ;;  %v2928_v44 = vor.u32 %v3130_v43, %v2927_v42  ;;  %v3818_v1 = vld [vmem:[#allocation8 + $0x3] ss:$8 sm:$0x3] }
 0x17d   : > { %1953 = vmatpush.bf16.msrb.mxu3 %v2928_v44  ;;  %v3116_v44 = vld [vmem:[#allocation7 + $0x534] sm:$0xf0] }
 0x181   : > { %1954 = vmatpush.bf16.msrb.mxu3 %v2924_v47 }
 0x185   : > { %1955 = vmatpush.bf16.msrb.mxu3 %v2920_v58  ;;  %v2867_v58 = vld [vmem:[#allocation7 + $0x520] sm:$0xf] }
 0x1d8   : > { %v1277_v48 = vpop.f32.mrf.mxu0 }
 0x1d9   : > { %v1291_v49 = vpop.f32.mrf.mxu1 }
 0x1da   : > { %v1292_v13 = vadd.f32 %v1291_v49, %v1277_v48  ;;  %v2895_v48 = vld [vmem:[#allocation7 + $0x590] sm:$0xf]  ;;  %v3122_v49 = vld [vmem:[#allocation7 + $0x594] sm:$0xf0] }
 0x1db   : > { %v2896_v50 = vor.u32 %v3122_v49, %v2895_v48 }
 0x1dd   : > { %1939 = vmatpush.bf16.msrb.mxu2 %v2896_v50 }
 0x1de   : > { %v1249_v4 = vpop.f32.mrf.mxu2 }
 0x1df   : > { %v1263_v7 = vpop.f32.mrf.mxu3 }
 0x1e0   : > { %v1279_v9 = vpop.f32.mrf.mxu0  ;;  %v1264_v5 = vadd.f32 %v1263_v7, %v1249_v4  ;;  %v2915_v4 = vld [vmem:[#allocation7 + $0x5e0] sm:$0xf]  ;;  %v3127_v7 = vld [vmem:[#allocation7 + $0x5e4] sm:$0xf0] }
 0x1e1   : > { %v1293_v10 = vpop.f32.mrf.mxu1  ;;  %1940 = vmatpush.bf16.msrb.mxu2 %v2892_v2  ;;  %v2916_v8 = vor.u32 %v3127_v7, %v2915_v4  ;;  %v2868_v2 = vor.u32 %v3115_v59, %v2867_v58 }
 0x1e2   : > { %v1294_v6 = vadd.f32 %v1293_v10, %v1279_v9  ;;  %v2887_v9 = vld [vmem:[#allocation7 + $0x570] sm:$0xf]  ;;  %v3120_v10 = vld [vmem:[#allocation7 + $0x574] sm:$0xf0] }
 0x1e3   : > { %1956 = vmatpush.bf16.msrb.mxu3 %v2916_v8 }
 0x1e6   : > { %v1251_v60 = vpop.f32.mrf.mxu2 }
 0x1e7   : > { %v1265_v11 = vpop.f32.mrf.mxu3 }
 0x1e8   : > { %v1493_v36 = vpop.f32.mrf.mxu0  ;;  %v1266_v28 = vadd.f32 %v1265_v11, %v1251_v60  ;;  %v1533_v60 = vperm.slane %v3818_v1, 1  ;;  %v2888_v11 = vor.u32 %v3120_v10, %v2887_v9 }
 0x1e9   : > { %v1507_v12 = vpop.f32.mrf.mxu1  ;;  %v1494_v14 = vadd.f32 %v1493_v36, %v1292_v13  ;;  %v2911_v36 = vld [vmem:[#allocation7 + $0x5d0] sm:$0xf] }
 0x1ea   : > { %1941 = vmatpush.bf16.msrb.mxu2 %v2888_v11 }
 0x1eb   : > { %v1508_v20 = vadd.f32 %v1507_v12, %v1494_v14  ;;  %v3126_v12 = vld [vmem:[#allocation7 + $0x5d4] sm:$0xf0] }
 0x1ec   : > { %v2912_v13 = vor.u32 %v3126_v12, %v2911_v36 }
 0x1ed   : > { %v1520_v26 = vadd.f32 %v1516_v21, %v1508_v20  ;;  %v2907_v20 = vld [vmem:[#allocation7 + $0x5c0] sm:$0xf] }
 0x1ee   : > { %v1465_v16 = vpop.f32.mrf.mxu2  ;;  %1957 = vmatpush.bf16.msrb.mxu3 %v2912_v13 }
 0x1ef   : > { %v1479_v62 = vpop.f32.mrf.mxu3  ;;  %v1466_v22 = vadd.f32 %v1465_v16, %v1264_v5  ;;  %v1524_v34 = vmax.f32 %v1520_v26, 0.0  ;;  %v2883_v16 = vld [vmem:[#allocation7 + $0x560] sm:$0xf]  ;;  %v3118_v26 = vld [vmem:[#allocation7 + $0x554] sm:$0xf0] }
 0x1f0   : > { %v1495_v23 = vpop.f32.mrf.mxu0 }
 0x1f1   : > { %v1496_v24 = vadd.f32 %v1495_v23, %v1294_v6  ;;  %v1509_v25 = vpop.f32.mrf.mxu1  ;;  %v1480_v29 = vadd.f32 %v1479_v62, %v1466_v22  ;;  %v3119_v62 = vld [vmem:[#allocation7 + $0x564] sm:$0xf0]  ;;  %v1532_v23 = vperm.slane %v3818_v1, 0 }
 0x1f2   : > { %v2884_v6 = vor.u32 %v3119_v62, %v2883_v16 }
 0x1f3   : > { %v1510_v27 = vadd.f32 %v1509_v25, %v1496_v24  ;;  %v1519_v37 = vadd.f32 %v1515_v30, %v1480_v29  ;;  %v2879_v25 = vld [vmem:[#allocation7 + $0x550] sm:$0xf] }
 0x1f4   : > { %1942 = vmatpush.bf16.msrb.mxu2 %v2884_v6 }
 0x1f5   : > { %v1522_v31 = vadd.f32 %v1516_v21, %v1510_v27  ;;  %v1523_v39 = vmax.f32 %v1519_v37, 0.0  ;;  %v3125_v21 = vld [vmem:[#allocation7 + $0x5c4] sm:$0xf0] }
 0x1f6   : > { %v1467_v32 = vpop.f32.mrf.mxu2  ;;  %v2908_v24 = vor.u32 %v3125_v21, %v2907_v20  ;;  %v3117_v37 = vld [vmem:[#allocation7 + $0x544] sm:$0xf0]  ;;  %v1829_v21 = vsub.f32 %v3812_v63, %v3789_v54 }
 0x1f7   : > { %v1468_v33 = vadd.f32 %v1467_v32, %v1266_v28  ;;  %v1526_v35 = vmax.f32 %v1522_v31, 0.0  ;;  %v1481_v61 = vpop.f32.mrf.mxu3  ;;  %v2880_v28 = vor.u32 %v3118_v26, %v2879_v25  ;;  %v2903_v31 = vld [vmem:[#allocation7 + $0x5b0] sm:$0xf]  ;;  %v3124_v32 = vld [vmem:[#allocation7 + $0x5b4] sm:$0xf0] }
 0x1f8   : > { %1958 = vmatpush.bf16.msrb.mxu3 %v2908_v24 }
 0x1f9   : > { %v1482_v55 = vadd.f32 %v1481_v61, %v1468_v33  ;;  %v1528_v38 = vpack.c.bf16 %v1526_v35, %v1524_v34  ;;  %1943 = vmatpush.bf16.msrb.mxu2 %v2880_v28  ;;  %v2904_v34 = vor.u32 %v3124_v32, %v2903_v31  ;;  %v2875_v61 = vld [vmem:[#allocation7 + $0x540] sm:$0xf] }
 0x1fb   : > { %v1521_v3 = vadd.f32 %v1515_v30, %v1482_v55  ;;  %1718 = vmatmul.bf16.vlgmr.msra.gmra.mxu3 %v1528_v38  ;;  %1746 = vmatmul.bf16.vlgmr.msrb.gmra.mxu1 %v1528_v38 }
 0x1fc   : > { %1959 = vmatpush.bf16.msrb.mxu3 %v2904_v34 }
 0x1fd   : > { %v1525_v40 = vmax.f32 %v1521_v3, 0.0  ;;  %v2876_v3 = vor.u32 %v3117_v37, %v2875_v61  ;;  %v1828_v37 = vsub.f32 %v3806_v17, %v3787_v53 }
 0x1ff   : > { %v1527_v41 = vpack.c.bf16 %v1525_v40, %v1523_v39  ;;  %v2899_v39 = vld [vmem:[#allocation7 + $0x5a0] sm:$0xf]  ;;  %v3123_v40 = vld [vmem:[#allocation7 + $0x5a4] sm:$0xf0]  ;;  %1944 = vmatpush.bf16.msrb.mxu2 %v2876_v3 }
 0x200   : > { %v2900_v43 = vor.u32 %v3123_v40, %v2899_v39 }
 0x201   : > { %1704 = vmatmul.bf16.vlgmr.msra.gmra.mxu2 %v1527_v41  ;;  %1732 = vmatmul.bf16.vlgmr.msrb.gmra.mxu0 %v1527_v41  ;;  %v2871_v41 = vld [vmem:[#allocation7 + $0x530] sm:$0xf] }
 0x202   : > { %v2872_v47 = vor.u32 %v3116_v44, %v2871_v41  ;;  %1960 = vmatpush.bf16.msrb.mxu3 %v2900_v43 }
 0x204   : > { %1945 = vmatpush.bf16.msrb.mxu2 %v2872_v47 }
 0x208   : > { %1946 = vmatpush.bf16.msrb.mxu2 %v2868_v2 }
 0x278   : > { %v1747_v14 = vpop.f32.mrf.mxu1 }
 0x27e   : > { %v1733_v15 = vpop.f32.mrf.mxu0  ;;  %v1719_v29 = vpop.f32.mrf.mxu3 }
 0x27f   : > { %v1734_v5 = vadd.f32 %v1733_v15, %v1533_v60 }
 0x280   : > { %v1749_v42 = vpop.f32.mrf.mxu1 }
 0x281   : > { %v1748_v22 = vadd.f32 %v1747_v14, %v1734_v5 }
 0x283   : > { %v2862_v27 = vmul.f32 -1.442695, %v1748_v22 }
 0x284   : > { %v1705_v30 = vpop.f32.mrf.mxu2 }
 0x285   : > { %3210 = vpow2.f32 %v2862_v27  ;;  %v1706_v33 = vadd.f32 %v1705_v30, %v1532_v23 }
 0x286   : > { %v1735_v35 = vpop.f32.mrf.mxu0  ;;  %v1721_v0 = vpop.f32.mrf.mxu3 }
 0x287   : > { %v1720_v55 = vadd.f32 %v1719_v29, %v1706_v33  ;;  %v1736_v38 = vadd.f32 %v1735_v35, %v1533_v60 }
 0x289   : > { %v2861_v45 = vmul.f32 -1.442695, %v1720_v55  ;;  %v1750_v46 = vadd.f32 %v1749_v42, %v1736_v38 }
 0x28b   : > { %v3211_v48 = vpop.eup %3210  ;;  %3212 = vpow2.f32 %v2861_v45  ;;  %v2864_v49 = vmul.f32 -1.442695, %v1750_v46 }
 0x28c   : > { %v1765_v50 = vadd.f32 1.0, %v3211_v48  ;;  %v1707_v51 = vpop.f32.mrf.mxu2 }
 0x28d   : > { %3214 = vpow2.f32 %v2864_v49  ;;  %v1708_v52 = vadd.f32 %v1707_v51, %v1532_v23 }
 0x28e   : > { %3216 = vrcp.f32 %v1765_v50  ;;  %v1794_v12 = vand.u32 2147483648, %v1765_v50  ;;  %v1792_v15 = vand.u32 2147483647, %v1765_v50  ;;  %vm1788_vm2 = vweird.f32 %v1765_v50 }
 0x28f   : > { %v1722_v1 = vadd.f32 %v1721_v0, %v1708_v52  ;;  %v1830_v52 = vsub.f32 %v3808_v18, %v3791_v56 }
 0x290   : > { %v1795_v22 = vor.u32 1.1754944e-38, %v1794_v12  ;;  %vm1793_vm4 = vcmp.eq.f32.partialorder %v1792_v15, 8.507059e+37 }
 0x291   : > { %v3213_v4 = vpop.eup %3212  ;;  %v2863_v7 = vmul.f32 -1.442695, %v1722_v1 }
 0x292   : > { %v1764_v8 = vadd.f32 1.0, %v3213_v4 }
 0x293   : > { %v3215_v9 = vpop.eup %3214  ;;  %3218 = vpow2.f32 %v2863_v7 }
 0x294   : > { %v3217_v10 = vpop.eup %3216  ;;  %3220 = vrcp.f32 %v1764_v8  ;;  %v1767_v60 = vadd.f32 1.0, %v3215_v9  ;;  %v1777_v27 = vand.u32 2147483647, %v1764_v8  ;;  %v1779_v28 = vand.u32 2147483648, %v1764_v8 }
 0x295   : > { %v1784_v11 = vmul.f32 %v3217_v10, %v1765_v50  ;;  %vm1789_vm1 = vweird.f32 %v3217_v10  ;;  %vm1773_vm6 = vweird.f32 %v1764_v8 }
 0x296   : > { %3222 = vrcp.f32 %v1767_v60  ;;  %vm1790_vm3 = vmor %vm1788_vm2, %vm1789_vm1  ;;  %v1822_v32 = vand.u32 2147483647, %v1767_v60  ;;  %v1824_v33 = vand.u32 2147483648, %v1767_v60  ;;  %vm1818_vm8 = vweird.f32 %v1767_v60 }
 0x297   : > { %v1785_v36 = vsub.f32 1.0, %v1784_v11  ;;  %v1780_v55 = vor.u32 1.1754944e-38, %v1779_v28  ;;  %vm1778_vm10 = vcmp.eq.f32.partialorder %v1777_v27, 8.507059e+37 }
 0x298   : > { %v1825_v40 = vor.u32 1.1754944e-38, %v1824_v33  ;;  %vm1823_vm12 = vcmp.eq.f32.partialorder %v1822_v32, 8.507059e+37 }
 0x299   : > { %v3219_v13 = vpop.eup %3218  ;;  %v1786_v14 = vmul.f32 %v3217_v10, %v1785_v36 }
 0x29a   : > { %v3221_v16 = vpop.eup %3220  ;;  %v3822_v62 = vadd.f32 1.0, %v3219_v13 }
 0x29b   : > { %v1769_v5 = vmul.f32 %v3221_v16, %v1764_v8  ;;  %v1787_v6 = vadd.f32 %v3217_v10, %v1786_v14  ;;  %vm1774_vm5 = vweird.f32 %v3221_v16 }
 0x29c   : > { %v3223_v20 = vpop.eup %3222  ;;  %3224 = vrcp.f32 %v3822_v62  ;;  %vm1775_vm9 = vmor %vm1773_vm6, %vm1774_vm5  ;;  %v1807_v45 = vand.u32 2147483647, %v3822_v62  ;;  %v1809_v46 = vand.u32 2147483648, %v3822_v62  ;;  %vm1803_vm14 = vweird.f32 %v3822_v62 }
 0x29d   : > { %v1770_v23 = vsub.f32 1.0, %v1769_v5  ;;  %v1814_v24 = vmul.f32 %v3223_v20, %v1767_v60  ;;  %v1791_v25 = vsel %vm1790_vm3, %v3217_v10, %v1787_v6  ;;  %vm1819_vm7 = vweird.f32 %v3223_v20 }
 0x29e   : > { %v1796_v26 = vsel %vm1793_vm4, %v1795_v22, %v1791_v25  ;;  %vm1820_vm11 = vmor %vm1818_vm8, %vm1819_vm7  ;;  %v1810_v51 = vor.u32 1.1754944e-38, %v1809_v46  ;;  %vm1808_vm0 = vcmp.eq.f32.partialorder %v1807_v45, 8.507059e+37 }
 0x29f   : > { %v1771_v29 = vmul.f32 %v3221_v16, %v1770_v23  ;;  %v1815_v30 = vsub.f32 1.0, %v1814_v24  ;;  %v1833_v31 = vmul.f32 %v1829_v21, %v1796_v26 }
 0x2a1   : > { %v1816_v63 = vmul.f32 %v3223_v20, %v1815_v30  ;;  %v1837_v34 = vadd.f32 %v1833_v31, %v3789_v54  ;;  %v1772_v35 = vadd.f32 %v3221_v16, %v1771_v29  ;;  %v1831_v54 = vsub.f32 %v3810_v19, %v3793_v57 }
 0x2a2   : > { %v3225_v61 = vpop.eup %3224 }
 0x2a3   : > { %v1799_v38 = vmul.f32 %v3225_v61, %v3822_v62  ;;  %v1817_v3 = vadd.f32 %v3223_v20, %v1816_v63  ;;  %1970 = vst [vmem:[%s3832_s15 + $0x8] sm:$0xff] %v1837_v34  ;;  %v1776_v39 = vsel %vm1775_vm9, %v3221_v16, %v1772_v35  ;;  %vm1804_vm13 = vweird.f32 %v3225_v61 }
 0x2a4   : > { %v1781_v17 = vsel %vm1778_vm10, %v1780_v55, %v1776_v39  ;;  %vm1805_vm15 = vmor %vm1803_vm14, %vm1804_vm13 }
 0x2a5   : > { %v1800_v41 = vsub.f32 1.0, %v1799_v38  ;;  %v1821_v42 = vsel %vm1820_vm11, %v3223_v20, %v1817_v3  ;;  %v1832_v43 = vmul.f32 %v1828_v37, %v1781_v17 }
 0x2a6   : > { %v1826_v44 = vsel %vm1823_vm12, %v1825_v40, %v1821_v42 }
 0x2a7   : > { %v1801_v47 = vmul.f32 %v3225_v61, %v1800_v41  ;;  %v1835_v48 = vmul.f32 %v1831_v54, %v1826_v44  ;;  %v1836_v19 = vadd.f32 %v1832_v43, %v3787_v53 }
 0x2a9   : > { %v1839_v49 = vadd.f32 %v1835_v48, %v3793_v57  ;;  %v1802_v50 = vadd.f32 %v3225_v61, %v1801_v47  ;;  %1969 = vst [vmem:[%s3832_s15] sm:$0xff] %v1836_v19  ;;  %v1842_v57 = vld [vmem:[#allocation8 + $0x4] ss:$0 sm:$0xff] }
 0x2ab   : > { %v1841_v58 = vpack.c.bf16 %v1839_v49, %v1837_v34  ;;  %1972 = vst [vmem:[%s3832_s15 + $0x18] sm:$0xff] %v1839_v49  ;;  %v1806_v59 = vsel %vm1805_vm15, %v3225_v61, %v1802_v50 }
 0x2ac   : > { %v1811_v0 = vsel %vm1808_vm0, %v1810_v51, %v1806_v59 }
 0x2ad   : > { %1961 = vmatmul.bf16.vlgmr.msrb.gmra.mxu3 %v1841_v58  ;;  %v1834_v53 = vmul.f32 %v1830_v52, %v1811_v0 }
 0x2af   : > { %v1838_v1 = vadd.f32 %v1834_v53, %v3791_v56 }
 0x2b1   : > { %v1840_v2 = vpack.c.bf16 %v1838_v1, %v1836_v19  ;;  %1971 = vst [vmem:[%s3832_s15 + $0x10] sm:$0xff] %v1838_v1 }
 0x2b3   : > { %1947 = vmatmul.bf16.vlgmr.msrb.gmra.mxu2 %v1840_v2 }
 0x330   : > { %v1962_v4 = vpop.f32.mrf.mxu3 }
 0x336   : > { %v1948_v7 = vpop.f32.mrf.mxu2 }
 0x337   : > { %v1949_v8 = vadd.f32 %v1948_v7, %v1842_v57 }
 0x338   : > { %v1964_v60 = vpop.f32.mrf.mxu3 }
 0x339   : > { %v1963_v18 = vadd.f32 %v1962_v4, %v1949_v8 }
 0x33b   : > { %1967 = vst [vmem:[%s337_s3] sm:$0xff] %v1963_v18 }
 0x33e   : > { %v1950_v9 = vpop.f32.mrf.mxu2 }
 0x33f   : > { %v1951_v10 = vadd.f32 %v1950_v9, %v1842_v57  ;;  %1985 = sbr.rel (!%p3984_p6) target bundleno = 868 (0x364), region = 56 }
 0x341   : > { %v1965_v11 = vadd.f32 %v1964_v60, %v1951_v10 }
 0x343   : > { %1968 = vst [vmem:[%s337_s3 + $0x8] sm:$0xff] %v1965_v11 }
 0x344   : > { %s4002_s23 = smov (!%p1988_p7, %s1987_s23), 2 }
 0x345   : > { %s2932_s11 = sshll.u32 %s4002_s23, 3 }
 0x346   : > { %s1991_s10 = ssub.s32 16, %s2932_s11 }
 0x347   : > { %s1992_s16 = sshll.u32 %s1991_s10, 4 }
 0x348   : > { %1993 = vsyncadd %s1974_s9, %s1992_s16  ;;  %p3861_p10 = scmp.ne.s32.totalorder %s2932_s11, 0  ;;  %s3131_s26 = sshll.u32 %s3565_s22, 4 }
 0x349   : > { %s1996_s8 = scalar_lea.hbm %s3962_s4, %s3131_s26  ;;  %s1998_s2 = sshll.u32 %s337_s3, 4  ;;  %s3869_s2 = int_to_ptr.vmem [resolvable:$true] %s1998_s2 }
 0x34a   : > { %s2000_s14 = sshll.u32 %s1996_s8, 4  ;;  %s3967_s29 = sshll.u32 %s4002_s23, 7  ;;  %s3871_s14 = int_to_ptr.hbm [resolvable:$true] %s2000_s14 }
 0x34b   : > { %s3364_s13 = sshra.s32 %s3869_s2, 4  ;;  %s3366_s11 = sshrl.u32 %s3967_s29, 4  ;;  %s3365_s13 = int_to_ptr.vmem [resolvable:$true] %s3364_s13 }
 0x34c   : > { %s3371_s10 = scalar_lea.vmem %s3365_s13, %s3366_s11  ;;  %s3508_s16 = smov [#allocation10]  }
 0x34d   : > { %p3372_p1 = scmp.ne.s32.totalorder %s3365_s13, %s3371_s10  ;;  %s3375_s17 = scalar_lea.vmem %s3508_s16, 32 }
 0x34e   : > { %p3377_p8 = scmp.lt.s32.totalorder %s3375_s17, %s3371_s10 }
 0x34f   : > { %p3373_p0 = pnand %p3372_p1, %p3861_p10 }
 0x351   : > { %p3374_p3 = pneg %p3373_p0 }
 0x353   : > { %p3379_p9 = pnand %p3377_p8, %p3374_p3 }
 0x355   : > { %3382 = shalt.err (!%p3379_p9)
}
 0x356   : > { %s3383_s3 = sshra.s32 %s3871_s14, 4  ;;  %s3394_s13 = scalar_lea.hbm %s3962_s4, 24  ;;  %s3384_s3 = int_to_ptr.hbm [resolvable:$true] %s3383_s3 }
 0x357   : > { %s3390_s26 = scalar_lea.hbm %s3384_s3, %s3366_s11  ;;  %p3395_p5 = scmp.lt.s32.totalorder %s3384_s3, %s3962_s4 }
 0x358   : > { %p3391_p4 = scmp.ne.s32.totalorder %s3384_s3, %s3390_s26  ;;  %p3396_p12 = scmp.lt.s32.totalorder %s3394_s13, %s3390_s26 }
 0x35a   : > { %p3392_p11 = pnand %p3391_p4, %p3861_p10  ;;  %p3397_p2 = por %p3396_p12, %p3395_p5 }
 0x35c   : > { %p3393_p13 = pneg %p3392_p11 }
 0x35e   : > { %p3398_p6 = pnand %p3397_p2, %p3393_p13 }
 0x360   : > { %3401 = shalt.err (!%p3398_p6)
}
 0x361   : > { %s3509_s10 = smov 128   ;;  %s3510_s11 = smov 8  }
 0x362   : > { %s3986_s16 = sshll.u32 %s4002_s23, 7 }
 0x363   : > { %2006 = dma.vmem_to_hbm [thread:$0]  (%p3861_p10), %s3869_s2, %s3986_s16, %s3871_s14, %s1974_s9, %s3509_s10, %s3509_s10, %s3510_s11  }
 0x364 PF: > { %p3987_p7 = scmp.ne.s32.totalorder %s3972_s30, 0 }
 0x365   : > { %s2937_s12 = sshll.u32 (%p3987_p7), %s3565_s22, 1  ;;  %s3988_s7 = scalar_lea.sflag (%p3987_p7), [#allocation12], %s3719_s25 }
 0x366   : > { %2009 = sbr.rel (!%p3987_p7) target bundleno = 907 (0x38b), region = 60  ;;  %s2011_s29 = ssub.s32 (%p3987_p7), 3, %s2937_s12 }
 0x367   : > { %p2012_p1 = scmp.lt.s32.totalorder (%p3987_p7), %s2011_s29, 2 }
 0x36b   : > { %s4004_s29 = smov (!%p2012_p1, %s2011_s29), 2 }
 0x36c   : > { %s3132_s17 = sshll.u32 %s4004_s29, 4 }
 0x36d   : > { %s2016_s3 = ssub.s32 32, %s3132_s17 }
 0x36e   : > { %s2017_s26 = sshll.u32 %s2016_s3, 4 }
 0x36f   : > { %2018 = vsyncadd %s3988_s7, %s2017_s26  ;;  %p3904_p10 = scmp.ne.s32.totalorder %s3132_s17, 0  ;;  %s3134_s9 = sshll.u32 %s3565_s22, 5 }
 0x370   : > { %s2022_s2 = scalar_lea.hbm %s3963_s5, %s3134_s9  ;;  %s2024_s14 = sshll.u32 %s3832_s15, 4  ;;  %s3913_s14 = int_to_ptr.vmem [resolvable:$true] %s2024_s14 }
 0x371   : > { %s2026_s8 = sshll.u32 %s2022_s2, 4  ;;  %s2944_s13 = sshll.u32 %s4004_s29, 8  ;;  %s3915_s8 = int_to_ptr.hbm [resolvable:$true] %s2026_s8 }
 0x372   : > { %s3403_s10 = sshra.s32 %s3913_s14, 4  ;;  %s3405_s11 = sshrl.u32 %s2944_s13, 4  ;;  %s3404_s10 = int_to_ptr.vmem [resolvable:$true] %s3403_s10 }
 0x373   : > { %s3410_s16 = scalar_lea.vmem %s3404_s10, %s3405_s11  ;;  %s3511_s22 = smov [#allocation11]  }
 0x374   : > { %p3411_p0 = scmp.ne.s32.totalorder %s3404_s10, %s3410_s16  ;;  %s3414_s12 = scalar_lea.vmem %s3511_s22, 64 }
 0x375   : > { %p3416_p9 = scmp.lt.s32.totalorder %s3414_s12, %s3410_s16 }
 0x376   : > { %p3412_p3 = pnand %p3411_p0, %p3904_p10 }
 0x378   : > { %p3413_p8 = pneg %p3412_p3 }
 0x37a   : > { %p3418_p4 = pnand %p3416_p9, %p3413_p8 }
 0x37c   : > { %3421 = shalt.err (!%p3418_p4)
}
 0x37d   : > { %s3422_s15 = sshra.s32 %s3915_s8, 4  ;;  %s3433_s7 = scalar_lea.hbm %s3963_s5, 48  ;;  %s3423_s15 = int_to_ptr.hbm [resolvable:$true] %s3422_s15 }
 0x37e   : > { %s3429_s17 = scalar_lea.hbm %s3423_s15, %s3405_s11  ;;  %p3434_p12 = scmp.lt.s32.totalorder %s3423_s15, %s3963_s5 }
 0x37f   : > { %p3430_p11 = scmp.ne.s32.totalorder %s3423_s15, %s3429_s17  ;;  %p3435_p2 = scmp.lt.s32.totalorder %s3433_s7, %s3429_s17 }
 0x381   : > { %p3431_p13 = pnand %p3430_p11, %p3904_p10  ;;  %p3436_p6 = por %p3435_p2, %p3434_p12 }
 0x383   : > { %p3432_p5 = pneg %p3431_p13 }
 0x385   : > { %p3437_p7 = pnand %p3436_p6, %p3432_p5 }
 0x387   : > { %3440 = shalt.err (!%p3437_p7)
}
 0x388   : > { %s3512_s28 = smov 256   ;;  %s3513_s2 = smov 16  }
 0x389   : > { %s3990_s10 = scalar_lea.sflag [#allocation12], %s3719_s25 }
 0x38a   : > { %2032 = dma.vmem_to_hbm [thread:$0]  (%p3904_p10), %s3913_s14, %s2944_s13, %s3915_s8, %s3990_s10, %s3512_s28, %s3512_s28, %s3513_s2  }
 0x38b PF: > { %s2041_s11 = sand.u32 1, %s3484_s18   ;;  %p3991_p1 = scmp.ne.s32.totalorder %s3973_s6, 0 }
 0x38c   : > { %p3992_p0 = scmp.ge.s32.totalorder %s3496_s21, 2  ;;  %s2042_s16 = scalar_lea.sflag [#allocation4], %s2041_s11 }
 0x38e   : > { %p3155_p3 = pnand %p3992_p0, %p3991_p1 }
 0x390   : > { %p3156_p8 = pneg %p3155_p3 }
 0x392   : > { %3475 = dma.done.wait (%p3156_p8), %s2042_s16, 256  }
 0x393   : > { %3477 = vsyncadd (%p3156_p8), %s2042_s16, 4294967040  ;;  %s2052_s22 = scalar_lea.sflag [#allocation12], %s2041_s11 }
 0x394   : > { %3479 = dma.done.wait (%p3156_p8), %s2052_s22, 512  }
 0x395   : > { %3481 = vsyncadd (%p3156_p8), %s2052_s22, 4294966784  ;;  %p26_p10 = scmp.ge.s32.totalorder %s3569_s24, 4   ;;  %s3993_s18 = smov %s3488_s19 }
 0x396   : > { %s3994_s19 = smov %s3492_s20  ;;  %s3995_s20 = smov %s3581_s27 }
 0x397   : > { %s3996_s21 = smov %s3569_s24  ;;  %28 = sbr.rel (!%p26_p10) target bundleno = 13 (0xd), region = 122 }
 0x39c   :  { %2058 = vsyncpa [#allocation3], 1 }
 0x39d   :  { %2060 = vsyncpa [#allocation3 + $0x1], 1 }
 0x39e   :  { %2061 = vsyncpa [#allocation6], 1 }
 0x39f   :  { %2063 = vsyncpa [#allocation6 + $0x1], 1 }
 0x3a0   :  { %2064 = vsyncpa [#allocation9], 1 }
 0x3a1   :  { %2065 = vsyncpa [#allocation4], 1 }
 0x3a2   :  { %2067 = vsyncpa [#allocation4 + $0x1], 1 }
 0x3a3   :  { %2068 = vsyncpa [#allocation12], 1 }
 0x3a4   :  { %2070 = vsyncpa [#allocation12 + $0x1], 1 }

</bundles_post_ra>
